<compile_context>
chip_gen: v7x
topology: tpu7x:2x2x1
jax: 0.10.0
libtpu: 0.0.40
codegen_flags: <defaults>
</compile_context>

<pallas_src>
import jax
import jax.numpy as jnp
import numpy as np
from jax.experimental import pallas as pl
from jax.experimental.pallas import tpu as pltpu


def gru_kernel(x_ref, wih_ref, whh_ref, bi_ref, bhn_ref, wout_ref, bout_ref,
               out_ref, hfinal_ref,
               gi_r_ref, gi_z_ref, gi_n_ref, hs_ref):
    """Whole-sequence GRU in one kernel invocation.

    x_ref:    (T, B, I)   time-major, batch padded to a multiple of 8
    wih_ref:  (3, I, H)   gate-separated W_i{r,z,n}^T
    whh_ref:  (3, H, H)   gate-separated W_h{r,z,n}^T
    bi_ref:   (3, 1, H)   [b_ir+b_hr, b_iz+b_hz, b_in]
    bhn_ref:  (1, H)      b_hn
    wout_ref: (H, O), bout_ref: (1, O)
    out_ref:  (T*B, O)    time-major flattened readout
    hfinal_ref: (B, H)
    gi_*_ref, hs_ref: (T, B, H) float32 VMEM scratch
    """
    T, B, I = x_ref.shape
    H = whh_ref.shape[-1]

    # ---- Phase 1: batched input projection for ALL timesteps (one MXU pass
    # per gate instead of T tiny matmuls). Gate-separated so the recurrence
    # never lane-slices at H boundaries.
    x_all = x_ref[...].reshape(T * B, I)
    gi_r_ref[...] = (jnp.dot(x_all, wih_ref[0], preferred_element_type=jnp.float32)
                     + bi_ref[0]).reshape(T, B, H)
    gi_z_ref[...] = (jnp.dot(x_all, wih_ref[1], preferred_element_type=jnp.float32)
                     + bi_ref[1]).reshape(T, B, H)
    gi_n_ref[...] = (jnp.dot(x_all, wih_ref[2], preferred_element_type=jnp.float32)
                     + bi_ref[2]).reshape(T, B, H)

    # ---- Phase 2: serial recurrence. Loop-invariant weights / bias broadcasts
    # are hoisted out of the loop (JAX does not CSE broadcasts inside loops).
    whh_r = whh_ref[0]
    whh_z = whh_ref[1]
    whh_n = whh_ref[2]
    b_hn = jnp.broadcast_to(bhn_ref[...], (B, H))

    def step(t, h_prev):
        gh_r = jnp.dot(h_prev, whh_r, preferred_element_type=jnp.float32)
        gh_z = jnp.dot(h_prev, whh_z, preferred_element_type=jnp.float32)
        gh_n = jnp.dot(h_prev, whh_n, preferred_element_type=jnp.float32)
        r = jax.nn.sigmoid(gi_r_ref[t] + gh_r)
        z = jax.nn.sigmoid(gi_z_ref[t] + gh_z)
        n = jnp.tanh(gi_n_ref[t] + r * (gh_n + b_hn))
        h_new = (1.0 - z) * n + z * h_prev
        hs_ref[t] = h_new
        return h_new

    h0 = jnp.zeros((B, H), jnp.float32)
    h_final = jax.lax.fori_loop(0, T, step, h0, unroll=True if T <= 32 else False)

    # ---- Phase 3: one batched readout matmul over all timesteps; final hidden
    # written exactly once.
    hs_all = hs_ref[...].reshape(T * B, H)
    out_ref[...] = (jnp.dot(hs_all, wout_ref[...], preferred_element_type=jnp.float32)
                    + bout_ref[...]).astype(out_ref.dtype)
    hfinal_ref[...] = h_final.astype(hfinal_ref.dtype)


@jax.jit
def gru_forward(x_btf, w_ih, w_hh, b_ih, b_hh, w_out, b_out):
    """x_btf: (B, T, I) batch_first input.

    Returns (output (B, T, O), hidden (1, B, H)) matching the PyTorch module.
    """
    B, T, I = x_btf.shape
    H = w_hh.shape[1]
    O = w_out.shape[0]
    B_pad = max(8, ((B + 7) // 8) * 8)   # full sublane group

    # Time-major, batch-padded input.
    x_tbf = jnp.transpose(x_btf, (1, 0, 2))                    # (T, B, I)
    if B_pad != B:
        x_tbf = jnp.pad(x_tbf, ((0, 0), (0, B_pad - B), (0, 0)))

    # Gate-separated weights, gate order (r, z, n) as in torch.nn.GRU.
    wih_g = jnp.transpose(w_ih.reshape(3, H, I), (0, 2, 1))    # (3, I, H)
    whh_g = jnp.transpose(w_hh.reshape(3, H, H), (0, 2, 1))    # (3, H, H)
    b_ih_g = b_ih.reshape(3, 1, H)
    b_hh_g = b_hh.reshape(3, 1, H)
    # Fold recurrent r/z biases into the precomputed input bias; keep b_hn apart.
    bi_g = jnp.concatenate([b_ih_g[0:1] + b_hh_g[0:1],
                            b_ih_g[1:2] + b_hh_g[1:2],
                            b_ih_g[2:3]], axis=0)              # (3, 1, H)
    b_hn = b_hh_g[2]                                           # (1, H)

    wout_t = jnp.transpose(w_out, (1, 0))                      # (H, O)
    bout = b_out.reshape(1, O)

    grid_spec = pltpu.PrefetchScalarGridSpec(
        num_scalar_prefetch=0,
        grid=(1,),
        in_specs=[
            pl.BlockSpec((T, B_pad, I), lambda i: (0, 0, 0)),  # x
            pl.BlockSpec((3, I, H), lambda i: (0, 0, 0)),      # W_ih^T (gate-sep)
            pl.BlockSpec((3, H, H), lambda i: (0, 0, 0)),      # W_hh^T (gate-sep)
            pl.BlockSpec((3, 1, H), lambda i: (0, 0, 0)),      # folded biases
            pl.BlockSpec((1, H), lambda i: (0, 0)),            # b_hn
            pl.BlockSpec((H, O), lambda i: (0, 0)),            # W_out^T
            pl.BlockSpec((1, O), lambda i: (0, 0)),            # b_out
        ],
        out_specs=[
            pl.BlockSpec((T * B_pad, O), lambda i: (0, 0)),    # readout (time-major, flat)
            pl.BlockSpec((B_pad, H), lambda i: (0, 0)),        # final hidden
        ],
        scratch_shapes=[
            pltpu.VMEM((T, B_pad, H), jnp.float32),            # gi_r
            pltpu.VMEM((T, B_pad, H), jnp.float32),            # gi_z
            pltpu.VMEM((T, B_pad, H), jnp.float32),            # gi_n
            pltpu.VMEM((T, B_pad, H), jnp.float32),            # h sequence
        ],
    )

    out_flat, h_final = pl.pallas_call(
        gru_kernel,
        out_shape=(
            jax.ShapeDtypeStruct((T * B_pad, O), jnp.float32),
            jax.ShapeDtypeStruct((B_pad, H), jnp.float32),
        ),
        grid_spec=grid_spec,
        compiler_params=pltpu.CompilerParams(
            dimension_semantics=("arbitrary",)),               # single sequential step
    )(x_tbf, wih_g, whh_g, bi_g, b_hn, wout_t, bout)

    out_tbo = out_flat.reshape(T, B_pad, O)[:, :B, :]          # (T, B, O)
    output = jnp.transpose(out_tbo, (1, 0, 2))                 # (B, T, O)
    hidden = h_final[:B][None, :, :]                           # (1, B, H)
    return output, hidden


def reference_forward(x_btf, w_ih, w_hh, b_ih, b_hh, w_out, b_out):
    """Pure-JAX reference (lax.scan) for correctness check."""
    B, T, I = x_btf.shape
    H = w_hh.shape[1]

    def step(h, x_t):
        gi = x_t @ w_ih.T + b_ih
        gh = h @ w_hh.T + b_hh
        i_r, i_z, i_n = gi[:, :H], gi[:, H:2 * H], gi[:, 2 * H:]
        h_r, h_z, h_n = gh[:, :H], gh[:, H:2 * H], gh[:, 2 * H:]
        r = jax.nn.sigmoid(i_r + h_r)
        z = jax.nn.sigmoid(i_z + h_z)
        n = jnp.tanh(i_n + r * h_n)
        h_new = (1.0 - z) * n + z * h
        return h_new, h_new

    h0 = jnp.zeros((B, H), jnp.float32)
    h_last, hs = jax.lax.scan(step, h0, jnp.transpose(x_btf, (1, 0, 2)))
    outs = hs @ w_out.T + b_out                                # (T, B, O)
    return jnp.transpose(outs, (1, 0, 2)), h_last[None]


if __name__ == "__main__":
    # Small shapes consistent with the module: batch=2, seq=8, input=16,
    # hidden=32, output=8.
    B, T, I, H, O = 2, 8, 16, 32, 8

    key = jax.random.PRNGKey(0)
    ks = jax.random.split(key, 7)
    k_gru = 1.0 / np.sqrt(H)  # PyTorch default init range for nn.GRU / nn.Linear

    x = jax.random.normal(ks[0], (B, T, I), jnp.float32)
    w_ih = jax.random.uniform(ks[1], (3 * H, I), jnp.float32, -k_gru, k_gru)
    w_hh = jax.random.uniform(ks[2], (3 * H, H), jnp.float32, -k_gru, k_gru)
    b_ih = jax.random.uniform(ks[3], (3 * H,), jnp.float32, -k_gru, k_gru)
    b_hh = jax.random.uniform(ks[4], (3 * H,), jnp.float32, -k_gru, k_gru)
    w_out = jax.random.uniform(ks[5], (O, H), jnp.float32, -k_gru, k_gru)
    b_out = jax.random.uniform(ks[6], (O,), jnp.float32, -k_gru, k_gru)

    out, hidden = gru_forward(x, w_ih, w_hh, b_ih, b_hh, w_out, b_out)
    jax.block_until_ready((out, hidden))

    ref_out, ref_hidden = reference_forward(x, w_ih, w_hh, b_ih, b_hh, w_out, b_out)
    np.testing.assert_allclose(np.asarray(out), np.asarray(ref_out), rtol=1e-5, atol=1e-5)
    np.testing.assert_allclose(np.asarray(hidden), np.asarray(ref_hidden), rtol=1e-5, atol=1e-5)

    assert out.shape == (B, T, O) and hidden.shape == (1, B, H)
    print("KERNEL_OK")
</pallas_src>

<mosaic_0001>
module attributes {stable_mosaic.version = 11 : i64} {
  func.func @gru_kernel(%arg0: i32, %arg1: memref<8x8x16xf32, #tpu.memory_space<vmem>>, %arg2: memref<3x16x32xf32, #tpu.memory_space<vmem>>, %arg3: memref<3x32x32xf32, #tpu.memory_space<vmem>>, %arg4: memref<3x1x32xf32, #tpu.memory_space<vmem>>, %arg5: memref<1x32xf32, #tpu.memory_space<vmem>>, %arg6: memref<32x8xf32, #tpu.memory_space<vmem>>, %arg7: memref<1x8xf32, #tpu.memory_space<vmem>>, %arg8: memref<64x8xf32, #tpu.memory_space<vmem>>, %arg9: memref<8x32xf32, #tpu.memory_space<vmem>>, %arg10: memref<8x8x32xf32, #tpu.memory_space<vmem>>, %arg11: memref<8x8x32xf32, #tpu.memory_space<vmem>>, %arg12: memref<8x8x32xf32, #tpu.memory_space<vmem>>, %arg13: memref<8x8x32xf32, #tpu.memory_space<vmem>>) attributes {dimension_semantics = [#tpu.dimension_semantics<arbitrary>], iteration_bounds = array<i64: 1>, scalar_prefetch = 0 : i64, scratch_operands = 4 : i64, tpu.core_type = #tpu.core_type<tc>, window_params = [{pipeline_mode = #tpu.pipeline_mode<synchronous>, transform_indices = @transform_0, window_bounds = array<i64: 8, 8, 16>}, {pipeline_mode = #tpu.pipeline_mode<synchronous>, transform_indices = @transform_1, window_bounds = array<i64: 3, 16, 32>}, {pipeline_mode = #tpu.pipeline_mode<synchronous>, transform_indices = @transform_2, window_bounds = array<i64: 3, 32, 32>}, {pipeline_mode = #tpu.pipeline_mode<synchronous>, transform_indices = @transform_3, window_bounds = array<i64: 3, 1, 32>}, {pipeline_mode = #tpu.pipeline_mode<synchronous>, transform_indices = @transform_4, window_bounds = array<i64: 1, 32>}, {pipeline_mode = #tpu.pipeline_mode<synchronous>, transform_indices = @transform_5, window_bounds = array<i64: 32, 8>}, {pipeline_mode = #tpu.pipeline_mode<synchronous>, transform_indices = @transform_6, window_bounds = array<i64: 1, 8>}, {pipeline_mode = #tpu.pipeline_mode<synchronous>, transform_indices = @transform_7, window_bounds = array<i64: 64, 8>}, {pipeline_mode = #tpu.pipeline_mode<synchronous>, transform_indices = @transform_8, window_bounds = array<i64: 8, 32>}]} {
    %c0 = arith.constant 0 : index
    %c0_0 = arith.constant 0 : index
    %c0_1 = arith.constant 0 : index
    %0 = vector.load %arg1[%c0, %c0_0, %c0_1] : memref<8x8x16xf32, #tpu.memory_space<vmem>>, vector<8x8x16xf32>
    %1 = vector.shape_cast %0 : vector<8x8x16xf32> to vector<64x16xf32>
    %c0_2 = arith.constant 0 : index
    %c0_3 = arith.constant 0 : index
    %c0_4 = arith.constant 0 : index
    %2 = vector.load %arg2[%c0_2, %c0_3, %c0_4] : memref<3x16x32xf32, #tpu.memory_space<vmem>>, vector<1x16x32xf32>
    %3 = vector.shape_cast %2 : vector<1x16x32xf32> to vector<16x32xf32>
    %cst = arith.constant dense<0.000000e+00> : vector<64x32xf32>
    %4 = tpu.matmul %1, %3, %cst {dimension_numbers = #tpu.dot_dimension_numbers<[1], [0], [0], [1], [0, 0, 1, 1], [], []>} : vector<64x16xf32>, vector<16x32xf32>, vector<64x32xf32> -> vector<64x32xf32>
    %c0_5 = arith.constant 0 : index
    %c0_6 = arith.constant 0 : index
    %c0_7 = arith.constant 0 : index
    %5 = vector.load %arg4[%c0_5, %c0_6, %c0_7] : memref<3x1x32xf32, #tpu.memory_space<vmem>>, vector<1x1x32xf32>
    %6 = vector.shape_cast %5 : vector<1x1x32xf32> to vector<1x32xf32>
    %7 = vector.broadcast %6 : vector<1x32xf32> to vector<64x32xf32>
    %8 = arith.addf %4, %7 : vector<64x32xf32>
    %9 = vector.shape_cast %8 : vector<64x32xf32> to vector<8x8x32xf32>
    %c0_8 = arith.constant 0 : index
    %c0_9 = arith.constant 0 : index
    %c0_10 = arith.constant 0 : index
    %10 = vector.load %arg10[%c0_8, %c0_9, %c0_10] : memref<8x8x32xf32, #tpu.memory_space<vmem>>, vector<8x8x32xf32>
    tpu.vector_store %arg10[%c0_8, %c0_9, %c0_10], %9 {strides = array<i32>} : memref<8x8x32xf32, #tpu.memory_space<vmem>>, vector<8x8x32xf32>,
    %c1 = arith.constant 1 : index
    %c0_11 = arith.constant 0 : index
    %c0_12 = arith.constant 0 : index
    %11 = vector.load %arg2[%c1, %c0_11, %c0_12] : memref<3x16x32xf32, #tpu.memory_space<vmem>>, vector<1x16x32xf32>
    %12 = vector.shape_cast %11 : vector<1x16x32xf32> to vector<16x32xf32>
    %cst_13 = arith.constant dense<0.000000e+00> : vector<64x32xf32>
    %13 = tpu.matmul %1, %12, %cst_13 {dimension_numbers = #tpu.dot_dimension_numbers<[1], [0], [0], [1], [0, 0, 1, 1], [], []>} : vector<64x16xf32>, vector<16x32xf32>, vector<64x32xf32> -> vector<64x32xf32>
    %c1_14 = arith.constant 1 : index
    %c0_15 = arith.constant 0 : index
    %c0_16 = arith.constant 0 : index
    %14 = vector.load %arg4[%c1_14, %c0_15, %c0_16] : memref<3x1x32xf32, #tpu.memory_space<vmem>>, vector<1x1x32xf32>
    %15 = vector.shape_cast %14 : vector<1x1x32xf32> to vector<1x32xf32>
    %16 = vector.broadcast %15 : vector<1x32xf32> to vector<64x32xf32>
    %17 = arith.addf %13, %16 : vector<64x32xf32>
    %18 = vector.shape_cast %17 : vector<64x32xf32> to vector<8x8x32xf32>
    %c0_17 = arith.constant 0 : index
    %c0_18 = arith.constant 0 : index
    %c0_19 = arith.constant 0 : index
    %19 = vector.load %arg11[%c0_17, %c0_18, %c0_19] : memref<8x8x32xf32, #tpu.memory_space<vmem>>, vector<8x8x32xf32>
    tpu.vector_store %arg11[%c0_17, %c0_18, %c0_19], %18 {strides = array<i32>} : memref<8x8x32xf32, #tpu.memory_space<vmem>>, vector<8x8x32xf32>,
    %c2 = arith.constant 2 : index
    %c0_20 = arith.constant 0 : index
    %c0_21 = arith.constant 0 : index
    %20 = vector.load %arg2[%c2, %c0_20, %c0_21] : memref<3x16x32xf32, #tpu.memory_space<vmem>>, vector<1x16x32xf32>
    %21 = vector.shape_cast %20 : vector<1x16x32xf32> to vector<16x32xf32>
    %cst_22 = arith.constant dense<0.000000e+00> : vector<64x32xf32>
    %22 = tpu.matmul %1, %21, %cst_22 {dimension_numbers = #tpu.dot_dimension_numbers<[1], [0], [0], [1], [0, 0, 1, 1], [], []>} : vector<64x16xf32>, vector<16x32xf32>, vector<64x32xf32> -> vector<64x32xf32>
    %c2_23 = arith.constant 2 : index
    %c0_24 = arith.constant 0 : index
    %c0_25 = arith.constant 0 : index
    %23 = vector.load %arg4[%c2_23, %c0_24, %c0_25] : memref<3x1x32xf32, #tpu.memory_space<vmem>>, vector<1x1x32xf32>
    %24 = vector.shape_cast %23 : vector<1x1x32xf32> to vector<1x32xf32>
    %25 = vector.broadcast %24 : vector<1x32xf32> to vector<64x32xf32>
    %26 = arith.addf %22, %25 : vector<64x32xf32>
    %27 = vector.shape_cast %26 : vector<64x32xf32> to vector<8x8x32xf32>
    %c0_26 = arith.constant 0 : index
    %c0_27 = arith.constant 0 : index
    %c0_28 = arith.constant 0 : index
    %28 = vector.load %arg12[%c0_26, %c0_27, %c0_28] : memref<8x8x32xf32, #tpu.memory_space<vmem>>, vector<8x8x32xf32>
    tpu.vector_store %arg12[%c0_26, %c0_27, %c0_28], %27 {strides = array<i32>} : memref<8x8x32xf32, #tpu.memory_space<vmem>>, vector<8x8x32xf32>,
    %c0_29 = arith.constant 0 : index
    %c0_30 = arith.constant 0 : index
    %c0_31 = arith.constant 0 : index
    %29 = vector.load %arg3[%c0_29, %c0_30, %c0_31] : memref<3x32x32xf32, #tpu.memory_space<vmem>>, vector<1x32x32xf32>
    %30 = vector.shape_cast %29 : vector<1x32x32xf32> to vector<32x32xf32>
    %c1_32 = arith.constant 1 : index
    %c0_33 = arith.constant 0 : index
    %c0_34 = arith.constant 0 : index
    %31 = vector.load %arg3[%c1_32, %c0_33, %c0_34] : memref<3x32x32xf32, #tpu.memory_space<vmem>>, vector<1x32x32xf32>
    %32 = vector.shape_cast %31 : vector<1x32x32xf32> to vector<32x32xf32>
    %c2_35 = arith.constant 2 : index
    %c0_36 = arith.constant 0 : index
    %c0_37 = arith.constant 0 : index
    %33 = vector.load %arg3[%c2_35, %c0_36, %c0_37] : memref<3x32x32xf32, #tpu.memory_space<vmem>>, vector<1x32x32xf32>
    %34 = vector.shape_cast %33 : vector<1x32x32xf32> to vector<32x32xf32>
    %c0_38 = arith.constant 0 : index
    %c0_39 = arith.constant 0 : index
    %35 = vector.load %arg5[%c0_38, %c0_39] : memref<1x32xf32, #tpu.memory_space<vmem>>, vector<1x32xf32>
    %36 = vector.shape_cast %35 : vector<1x32xf32> to vector<1x32xf32>
    %37 = vector.broadcast %36 : vector<1x32xf32> to vector<8x32xf32>
    %cst_40 = arith.constant 0.000000e+00 : f32
    %38 = vector.broadcast %cst_40 : f32 to vector<8x32xf32>
    %c0_i32 = arith.constant 0 : i32
    %cst_41 = arith.constant dense<0.000000e+00> : vector<8x32xf32>
    %39 = tpu.matmul %38, %30, %cst_41 {dimension_numbers = #tpu.dot_dimension_numbers<[1], [0], [0], [1], [0, 0, 1, 1], [], []>} : vector<8x32xf32>, vector<32x32xf32>, vector<8x32xf32> -> vector<8x32xf32>
    %cst_42 = arith.constant dense<0.000000e+00> : vector<8x32xf32>
    %40 = tpu.matmul %38, %32, %cst_42 {dimension_numbers = #tpu.dot_dimension_numbers<[1], [0], [0], [1], [0, 0, 1, 1], [], []>} : vector<8x32xf32>, vector<32x32xf32>, vector<8x32xf32> -> vector<8x32xf32>
    %cst_43 = arith.constant dense<0.000000e+00> : vector<8x32xf32>
    %41 = tpu.matmul %38, %34, %cst_43 {dimension_numbers = #tpu.dot_dimension_numbers<[1], [0], [0], [1], [0, 0, 1, 1], [], []>} : vector<8x32xf32>, vector<32x32xf32>, vector<8x32xf32> -> vector<8x32xf32>
    %42 = arith.index_cast %c0_i32 : i32 to index
    %c0_44 = arith.constant 0 : index
    %c0_45 = arith.constant 0 : index
    %43 = vector.load %arg10[%42, %c0_44, %c0_45] : memref<8x8x32xf32, #tpu.memory_space<vmem>>, vector<1x8x32xf32>
    %44 = vector.shape_cast %43 : vector<1x8x32xf32> to vector<8x32xf32>
    %45 = arith.addf %44, %39 : vector<8x32xf32>
    %46 = arith.negf %45 : vector<8x32xf32>
    %47 = math.exp %46 : vector<8x32xf32>
    %cst_46 = arith.constant 1.000000e+00 : f32
    %48 = vector.broadcast %cst_46 : f32 to vector<8x32xf32>
    %49 = arith.addf %48, %47 : vector<8x32xf32>
    %50 = arith.divf %48, %49 : vector<8x32xf32>
    %51 = arith.index_cast %c0_i32 : i32 to index
    %c0_47 = arith.constant 0 : index
    %c0_48 = arith.constant 0 : index
    %52 = vector.load %arg11[%51, %c0_47, %c0_48] : memref<8x8x32xf32, #tpu.memory_space<vmem>>, vector<1x8x32xf32>
    %53 = vector.shape_cast %52 : vector<1x8x32xf32> to vector<8x32xf32>
    %54 = arith.addf %53, %40 : vector<8x32xf32>
    %55 = arith.negf %54 : vector<8x32xf32>
    %56 = math.exp %55 : vector<8x32xf32>
    %cst_49 = arith.constant 1.000000e+00 : f32
    %57 = vector.broadcast %cst_49 : f32 to vector<8x32xf32>
    %58 = arith.addf %57, %56 : vector<8x32xf32>
    %59 = arith.divf %57, %58 : vector<8x32xf32>
    %60 = arith.index_cast %c0_i32 : i32 to index
    %c0_50 = arith.constant 0 : index
    %c0_51 = arith.constant 0 : index
    %61 = vector.load %arg12[%60, %c0_50, %c0_51] : memref<8x8x32xf32, #tpu.memory_space<vmem>>, vector<1x8x32xf32>
    %62 = vector.shape_cast %61 : vector<1x8x32xf32> to vector<8x32xf32>
    %63 = arith.addf %41, %37 : vector<8x32xf32>
    %64 = arith.mulf %50, %63 : vector<8x32xf32>
    %65 = arith.addf %62, %64 : vector<8x32xf32>
    %66 = math.tanh %65 : vector<8x32xf32>
    %cst_52 = arith.constant 1.000000e+00 : f32
    %67 = vector.broadcast %cst_52 : f32 to vector<8x32xf32>
    %68 = arith.subf %67, %59 : vector<8x32xf32>
    %69 = arith.mulf %68, %66 : vector<8x32xf32>
    %70 = arith.mulf %59, %38 : vector<8x32xf32>
    %71 = arith.addf %69, %70 : vector<8x32xf32>
    %72 = arith.index_cast %c0_i32 : i32 to index
    %c0_53 = arith.constant 0 : index
    %c0_54 = arith.constant 0 : index
    %73 = vector.load %arg13[%72, %c0_53, %c0_54] : memref<8x8x32xf32, #tpu.memory_space<vmem>>, vector<1x8x32xf32>
    %74 = vector.shape_cast %73 : vector<1x8x32xf32> to vector<8x32xf32>
    %75 = vector.shape_cast %71 : vector<8x32xf32> to vector<1x8x32xf32>
    tpu.vector_store %arg13[%72, %c0_53, %c0_54], %75 {strides = array<i32>} : memref<8x8x32xf32, #tpu.memory_space<vmem>>, vector<1x8x32xf32>,
    %c1_i32 = arith.constant 1 : i32
    %cst_55 = arith.constant dense<0.000000e+00> : vector<8x32xf32>
    %76 = tpu.matmul %71, %30, %cst_55 {dimension_numbers = #tpu.dot_dimension_numbers<[1], [0], [0], [1], [0, 0, 1, 1], [], []>} : vector<8x32xf32>, vector<32x32xf32>, vector<8x32xf32> -> vector<8x32xf32>
    %cst_56 = arith.constant dense<0.000000e+00> : vector<8x32xf32>
    %77 = tpu.matmul %71, %32, %cst_56 {dimension_numbers = #tpu.dot_dimension_numbers<[1], [0], [0], [1], [0, 0, 1, 1], [], []>} : vector<8x32xf32>, vector<32x32xf32>, vector<8x32xf32> -> vector<8x32xf32>
    %cst_57 = arith.constant dense<0.000000e+00> : vector<8x32xf32>
    %78 = tpu.matmul %71, %34, %cst_57 {dimension_numbers = #tpu.dot_dimension_numbers<[1], [0], [0], [1], [0, 0, 1, 1], [], []>} : vector<8x32xf32>, vector<32x32xf32>, vector<8x32xf32> -> vector<8x32xf32>
    %79 = arith.index_cast %c1_i32 : i32 to index
    %c0_58 = arith.constant 0 : index
    %c0_59 = arith.constant 0 : index
    %80 = vector.load %arg10[%79, %c0_58, %c0_59] : memref<8x8x32xf32, #tpu.memory_space<vmem>>, vector<1x8x32xf32>
    %81 = vector.shape_cast %80 : vector<1x8x32xf32> to vector<8x32xf32>
    %82 = arith.addf %81, %76 : vector<8x32xf32>
    %83 = arith.negf %82 : vector<8x32xf32>
    %84 = math.exp %83 : vector<8x32xf32>
    %cst_60 = arith.constant 1.000000e+00 : f32
    %85 = vector.broadcast %cst_60 : f32 to vector<8x32xf32>
    %86 = arith.addf %85, %84 : vector<8x32xf32>
    %87 = arith.divf %85, %86 : vector<8x32xf32>
    %88 = arith.index_cast %c1_i32 : i32 to index
    %c0_61 = arith.constant 0 : index
    %c0_62 = arith.constant 0 : index
    %89 = vector.load %arg11[%88, %c0_61, %c0_62] : memref<8x8x32xf32, #tpu.memory_space<vmem>>, vector<1x8x32xf32>
    %90 = vector.shape_cast %89 : vector<1x8x32xf32> to vector<8x32xf32>
    %91 = arith.addf %90, %77 : vector<8x32xf32>
    %92 = arith.negf %91 : vector<8x32xf32>
    %93 = math.exp %92 : vector<8x32xf32>
    %cst_63 = arith.constant 1.000000e+00 : f32
    %94 = vector.broadcast %cst_63 : f32 to vector<8x32xf32>
    %95 = arith.addf %94, %93 : vector<8x32xf32>
    %96 = arith.divf %94, %95 : vector<8x32xf32>
    %97 = arith.index_cast %c1_i32 : i32 to index
    %c0_64 = arith.constant 0 : index
    %c0_65 = arith.constant 0 : index
    %98 = vector.load %arg12[%97, %c0_64, %c0_65] : memref<8x8x32xf32, #tpu.memory_space<vmem>>, vector<1x8x32xf32>
    %99 = vector.shape_cast %98 : vector<1x8x32xf32> to vector<8x32xf32>
    %100 = arith.addf %78, %37 : vector<8x32xf32>
    %101 = arith.mulf %87, %100 : vector<8x32xf32>
    %102 = arith.addf %99, %101 : vector<8x32xf32>
    %103 = math.tanh %102 : vector<8x32xf32>
    %cst_66 = arith.constant 1.000000e+00 : f32
    %104 = vector.broadcast %cst_66 : f32 to vector<8x32xf32>
    %105 = arith.subf %104, %96 : vector<8x32xf32>
    %106 = arith.mulf %105, %103 : vector<8x32xf32>
    %107 = arith.mulf %96, %71 : vector<8x32xf32>
    %108 = arith.addf %106, %107 : vector<8x32xf32>
    %109 = arith.index_cast %c1_i32 : i32 to index
    %c0_67 = arith.constant 0 : index
    %c0_68 = arith.constant 0 : index
    %110 = vector.load %arg13[%109, %c0_67, %c0_68] : memref<8x8x32xf32, #tpu.memory_space<vmem>>, vector<1x8x32xf32>
    %111 = vector.shape_cast %110 : vector<1x8x32xf32> to vector<8x32xf32>
    %112 = vector.shape_cast %108 : vector<8x32xf32> to vector<1x8x32xf32>
    tpu.vector_store %arg13[%109, %c0_67, %c0_68], %112 {strides = array<i32>} : memref<8x8x32xf32, #tpu.memory_space<vmem>>, vector<1x8x32xf32>,
    %c2_i32 = arith.constant 2 : i32
    %cst_69 = arith.constant dense<0.000000e+00> : vector<8x32xf32>
    %113 = tpu.matmul %108, %30, %cst_69 {dimension_numbers = #tpu.dot_dimension_numbers<[1], [0], [0], [1], [0, 0, 1, 1], [], []>} : vector<8x32xf32>, vector<32x32xf32>, vector<8x32xf32> -> vector<8x32xf32>
    %cst_70 = arith.constant dense<0.000000e+00> : vector<8x32xf32>
    %114 = tpu.matmul %108, %32, %cst_70 {dimension_numbers = #tpu.dot_dimension_numbers<[1], [0], [0], [1], [0, 0, 1, 1], [], []>} : vector<8x32xf32>, vector<32x32xf32>, vector<8x32xf32> -> vector<8x32xf32>
    %cst_71 = arith.constant dense<0.000000e+00> : vector<8x32xf32>
    %115 = tpu.matmul %108, %34, %cst_71 {dimension_numbers = #tpu.dot_dimension_numbers<[1], [0], [0], [1], [0, 0, 1, 1], [], []>} : vector<8x32xf32>, vector<32x32xf32>, vector<8x32xf32> -> vector<8x32xf32>
    %116 = arith.index_cast %c2_i32 : i32 to index
    %c0_72 = arith.constant 0 : index
    %c0_73 = arith.constant 0 : index
    %117 = vector.load %arg10[%116, %c0_72, %c0_73] : memref<8x8x32xf32, #tpu.memory_space<vmem>>, vector<1x8x32xf32>
    %118 = vector.shape_cast %117 : vector<1x8x32xf32> to vector<8x32xf32>
    %119 = arith.addf %118, %113 : vector<8x32xf32>
    %120 = arith.negf %119 : vector<8x32xf32>
    %121 = math.exp %120 : vector<8x32xf32>
    %cst_74 = arith.constant 1.000000e+00 : f32
    %122 = vector.broadcast %cst_74 : f32 to vector<8x32xf32>
    %123 = arith.addf %122, %121 : vector<8x32xf32>
    %124 = arith.divf %122, %123 : vector<8x32xf32>
    %125 = arith.index_cast %c2_i32 : i32 to index
    %c0_75 = arith.constant 0 : index
    %c0_76 = arith.constant 0 : index
    %126 = vector.load %arg11[%125, %c0_75, %c0_76] : memref<8x8x32xf32, #tpu.memory_space<vmem>>, vector<1x8x32xf32>
    %127 = vector.shape_cast %126 : vector<1x8x32xf32> to vector<8x32xf32>
    %128 = arith.addf %127, %114 : vector<8x32xf32>
    %129 = arith.negf %128 : vector<8x32xf32>
    %130 = math.exp %129 : vector<8x32xf32>
    %cst_77 = arith.constant 1.000000e+00 : f32
    %131 = vector.broadcast %cst_77 : f32 to vector<8x32xf32>
    %132 = arith.addf %131, %130 : vector<8x32xf32>
    %133 = arith.divf %131, %132 : vector<8x32xf32>
    %134 = arith.index_cast %c2_i32 : i32 to index
    %c0_78 = arith.constant 0 : index
    %c0_79 = arith.constant 0 : index
    %135 = vector.load %arg12[%134, %c0_78, %c0_79] : memref<8x8x32xf32, #tpu.memory_space<vmem>>, vector<1x8x32xf32>
    %136 = vector.shape_cast %135 : vector<1x8x32xf32> to vector<8x32xf32>
    %137 = arith.addf %115, %37 : vector<8x32xf32>
    %138 = arith.mulf %124, %137 : vector<8x32xf32>
    %139 = arith.addf %136, %138 : vector<8x32xf32>
    %140 = math.tanh %139 : vector<8x32xf32>
    %cst_80 = arith.constant 1.000000e+00 : f32
    %141 = vector.broadcast %cst_80 : f32 to vector<8x32xf32>
    %142 = arith.subf %141, %133 : vector<8x32xf32>
    %143 = arith.mulf %142, %140 : vector<8x32xf32>
    %144 = arith.mulf %133, %108 : vector<8x32xf32>
    %145 = arith.addf %143, %144 : vector<8x32xf32>
    %146 = arith.index_cast %c2_i32 : i32 to index
    %c0_81 = arith.constant 0 : index
    %c0_82 = arith.constant 0 : index
    %147 = vector.load %arg13[%146, %c0_81, %c0_82] : memref<8x8x32xf32, #tpu.memory_space<vmem>>, vector<1x8x32xf32>
    %148 = vector.shape_cast %147 : vector<1x8x32xf32> to vector<8x32xf32>
    %149 = vector.shape_cast %145 : vector<8x32xf32> to vector<1x8x32xf32>
    tpu.vector_store %arg13[%146, %c0_81, %c0_82], %149 {strides = array<i32>} : memref<8x8x32xf32, #tpu.memory_space<vmem>>, vector<1x8x32xf32>,
    %c3_i32 = arith.constant 3 : i32
    %cst_83 = arith.constant dense<0.000000e+00> : vector<8x32xf32>
    %150 = tpu.matmul %145, %30, %cst_83 {dimension_numbers = #tpu.dot_dimension_numbers<[1], [0], [0], [1], [0, 0, 1, 1], [], []>} : vector<8x32xf32>, vector<32x32xf32>, vector<8x32xf32> -> vector<8x32xf32>
    %cst_84 = arith.constant dense<0.000000e+00> : vector<8x32xf32>
    %151 = tpu.matmul %145, %32, %cst_84 {dimension_numbers = #tpu.dot_dimension_numbers<[1], [0], [0], [1], [0, 0, 1, 1], [], []>} : vector<8x32xf32>, vector<32x32xf32>, vector<8x32xf32> -> vector<8x32xf32>
    %cst_85 = arith.constant dense<0.000000e+00> : vector<8x32xf32>
    %152 = tpu.matmul %145, %34, %cst_85 {dimension_numbers = #tpu.dot_dimension_numbers<[1], [0], [0], [1], [0, 0, 1, 1], [], []>} : vector<8x32xf32>, vector<32x32xf32>, vector<8x32xf32> -> vector<8x32xf32>
    %153 = arith.index_cast %c3_i32 : i32 to index
    %c0_86 = arith.constant 0 : index
    %c0_87 = arith.constant 0 : index
    %154 = vector.load %arg10[%153, %c0_86, %c0_87] : memref<8x8x32xf32, #tpu.memory_space<vmem>>, vector<1x8x32xf32>
    %155 = vector.shape_cast %154 : vector<1x8x32xf32> to vector<8x32xf32>
    %156 = arith.addf %155, %150 : vector<8x32xf32>
    %157 = arith.negf %156 : vector<8x32xf32>
    %158 = math.exp %157 : vector<8x32xf32>
    %cst_88 = arith.constant 1.000000e+00 : f32
    %159 = vector.broadcast %cst_88 : f32 to vector<8x32xf32>
    %160 = arith.addf %159, %158 : vector<8x32xf32>
    %161 = arith.divf %159, %160 : vector<8x32xf32>
    %162 = arith.index_cast %c3_i32 : i32 to index
    %c0_89 = arith.constant 0 : index
    %c0_90 = arith.constant 0 : index
    %163 = vector.load %arg11[%162, %c0_89, %c0_90] : memref<8x8x32xf32, #tpu.memory_space<vmem>>, vector<1x8x32xf32>
    %164 = vector.shape_cast %163 : vector<1x8x32xf32> to vector<8x32xf32>
    %165 = arith.addf %164, %151 : vector<8x32xf32>
    %166 = arith.negf %165 : vector<8x32xf32>
    %167 = math.exp %166 : vector<8x32xf32>
    %cst_91 = arith.constant 1.000000e+00 : f32
    %168 = vector.broadcast %cst_91 : f32 to vector<8x32xf32>
    %169 = arith.addf %168, %167 : vector<8x32xf32>
    %170 = arith.divf %168, %169 : vector<8x32xf32>
    %171 = arith.index_cast %c3_i32 : i32 to index
    %c0_92 = arith.constant 0 : index
    %c0_93 = arith.constant 0 : index
    %172 = vector.load %arg12[%171, %c0_92, %c0_93] : memref<8x8x32xf32, #tpu.memory_space<vmem>>, vector<1x8x32xf32>
    %173 = vector.shape_cast %172 : vector<1x8x32xf32> to vector<8x32xf32>
    %174 = arith.addf %152, %37 : vector<8x32xf32>
    %175 = arith.mulf %161, %174 : vector<8x32xf32>
    %176 = arith.addf %173, %175 : vector<8x32xf32>
    %177 = math.tanh %176 : vector<8x32xf32>
    %cst_94 = arith.constant 1.000000e+00 : f32
    %178 = vector.broadcast %cst_94 : f32 to vector<8x32xf32>
    %179 = arith.subf %178, %170 : vector<8x32xf32>
    %180 = arith.mulf %179, %177 : vector<8x32xf32>
    %181 = arith.mulf %170, %145 : vector<8x32xf32>
    %182 = arith.addf %180, %181 : vector<8x32xf32>
    %183 = arith.index_cast %c3_i32 : i32 to index
    %c0_95 = arith.constant 0 : index
    %c0_96 = arith.constant 0 : index
    %184 = vector.load %arg13[%183, %c0_95, %c0_96] : memref<8x8x32xf32, #tpu.memory_space<vmem>>, vector<1x8x32xf32>
    %185 = vector.shape_cast %184 : vector<1x8x32xf32> to vector<8x32xf32>
    %186 = vector.shape_cast %182 : vector<8x32xf32> to vector<1x8x32xf32>
    tpu.vector_store %arg13[%183, %c0_95, %c0_96], %186 {strides = array<i32>} : memref<8x8x32xf32, #tpu.memory_space<vmem>>, vector<1x8x32xf32>,
    %c4_i32 = arith.constant 4 : i32
    %cst_97 = arith.constant dense<0.000000e+00> : vector<8x32xf32>
    %187 = tpu.matmul %182, %30, %cst_97 {dimension_numbers = #tpu.dot_dimension_numbers<[1], [0], [0], [1], [0, 0, 1, 1], [], []>} : vector<8x32xf32>, vector<32x32xf32>, vector<8x32xf32> -> vector<8x32xf32>
    %cst_98 = arith.constant dense<0.000000e+00> : vector<8x32xf32>
    %188 = tpu.matmul %182, %32, %cst_98 {dimension_numbers = #tpu.dot_dimension_numbers<[1], [0], [0], [1], [0, 0, 1, 1], [], []>} : vector<8x32xf32>, vector<32x32xf32>, vector<8x32xf32> -> vector<8x32xf32>
    %cst_99 = arith.constant dense<0.000000e+00> : vector<8x32xf32>
    %189 = tpu.matmul %182, %34, %cst_99 {dimension_numbers = #tpu.dot_dimension_numbers<[1], [0], [0], [1], [0, 0, 1, 1], [], []>} : vector<8x32xf32>, vector<32x32xf32>, vector<8x32xf32> -> vector<8x32xf32>
    %190 = arith.index_cast %c4_i32 : i32 to index
    %c0_100 = arith.constant 0 : index
    %c0_101 = arith.constant 0 : index
    %191 = vector.load %arg10[%190, %c0_100, %c0_101] : memref<8x8x32xf32, #tpu.memory_space<vmem>>, vector<1x8x32xf32>
    %192 = vector.shape_cast %191 : vector<1x8x32xf32> to vector<8x32xf32>
    %193 = arith.addf %192, %187 : vector<8x32xf32>
    %194 = arith.negf %193 : vector<8x32xf32>
    %195 = math.exp %194 : vector<8x32xf32>
    %cst_102 = arith.constant 1.000000e+00 : f32
    %196 = vector.broadcast %cst_102 : f32 to vector<8x32xf32>
    %197 = arith.addf %196, %195 : vector<8x32xf32>
    %198 = arith.divf %196, %197 : vector<8x32xf32>
    %199 = arith.index_cast %c4_i32 : i32 to index
    %c0_103 = arith.constant 0 : index
    %c0_104 = arith.constant 0 : index
    %200 = vector.load %arg11[%199, %c0_103, %c0_104] : memref<8x8x32xf32, #tpu.memory_space<vmem>>, vector<1x8x32xf32>
    %201 = vector.shape_cast %200 : vector<1x8x32xf32> to vector<8x32xf32>
    %202 = arith.addf %201, %188 : vector<8x32xf32>
    %203 = arith.negf %202 : vector<8x32xf32>
    %204 = math.exp %203 : vector<8x32xf32>
    %cst_105 = arith.constant 1.000000e+00 : f32
    %205 = vector.broadcast %cst_105 : f32 to vector<8x32xf32>
    %206 = arith.addf %205, %204 : vector<8x32xf32>
    %207 = arith.divf %205, %206 : vector<8x32xf32>
    %208 = arith.index_cast %c4_i32 : i32 to index
    %c0_106 = arith.constant 0 : index
    %c0_107 = arith.constant 0 : index
    %209 = vector.load %arg12[%208, %c0_106, %c0_107] : memref<8x8x32xf32, #tpu.memory_space<vmem>>, vector<1x8x32xf32>
    %210 = vector.shape_cast %209 : vector<1x8x32xf32> to vector<8x32xf32>
    %211 = arith.addf %189, %37 : vector<8x32xf32>
    %212 = arith.mulf %198, %211 : vector<8x32xf32>
    %213 = arith.addf %210, %212 : vector<8x32xf32>
    %214 = math.tanh %213 : vector<8x32xf32>
    %cst_108 = arith.constant 1.000000e+00 : f32
    %215 = vector.broadcast %cst_108 : f32 to vector<8x32xf32>
    %216 = arith.subf %215, %207 : vector<8x32xf32>
    %217 = arith.mulf %216, %214 : vector<8x32xf32>
    %218 = arith.mulf %207, %182 : vector<8x32xf32>
    %219 = arith.addf %217, %218 : vector<8x32xf32>
    %220 = arith.index_cast %c4_i32 : i32 to index
    %c0_109 = arith.constant 0 : index
    %c0_110 = arith.constant 0 : index
    %221 = vector.load %arg13[%220, %c0_109, %c0_110] : memref<8x8x32xf32, #tpu.memory_space<vmem>>, vector<1x8x32xf32>
    %222 = vector.shape_cast %221 : vector<1x8x32xf32> to vector<8x32xf32>
    %223 = vector.shape_cast %219 : vector<8x32xf32> to vector<1x8x32xf32>
    tpu.vector_store %arg13[%220, %c0_109, %c0_110], %223 {strides = array<i32>} : memref<8x8x32xf32, #tpu.memory_space<vmem>>, vector<1x8x32xf32>,
    %c5_i32 = arith.constant 5 : i32
    %cst_111 = arith.constant dense<0.000000e+00> : vector<8x32xf32>
    %224 = tpu.matmul %219, %30, %cst_111 {dimension_numbers = #tpu.dot_dimension_numbers<[1], [0], [0], [1], [0, 0, 1, 1], [], []>} : vector<8x32xf32>, vector<32x32xf32>, vector<8x32xf32> -> vector<8x32xf32>
    %cst_112 = arith.constant dense<0.000000e+00> : vector<8x32xf32>
    %225 = tpu.matmul %219, %32, %cst_112 {dimension_numbers = #tpu.dot_dimension_numbers<[1], [0], [0], [1], [0, 0, 1, 1], [], []>} : vector<8x32xf32>, vector<32x32xf32>, vector<8x32xf32> -> vector<8x32xf32>
    %cst_113 = arith.constant dense<0.000000e+00> : vector<8x32xf32>
    %226 = tpu.matmul %219, %34, %cst_113 {dimension_numbers = #tpu.dot_dimension_numbers<[1], [0], [0], [1], [0, 0, 1, 1], [], []>} : vector<8x32xf32>, vector<32x32xf32>, vector<8x32xf32> -> vector<8x32xf32>
    %227 = arith.index_cast %c5_i32 : i32 to index
    %c0_114 = arith.constant 0 : index
    %c0_115 = arith.constant 0 : index
    %228 = vector.load %arg10[%227, %c0_114, %c0_115] : memref<8x8x32xf32, #tpu.memory_space<vmem>>, vector<1x8x32xf32>
    %229 = vector.shape_cast %228 : vector<1x8x32xf32> to vector<8x32xf32>
    %230 = arith.addf %229, %224 : vector<8x32xf32>
    %231 = arith.negf %230 : vector<8x32xf32>
    %232 = math.exp %231 : vector<8x32xf32>
    %cst_116 = arith.constant 1.000000e+00 : f32
    %233 = vector.broadcast %cst_116 : f32 to vector<8x32xf32>
    %234 = arith.addf %233, %232 : vector<8x32xf32>
    %235 = arith.divf %233, %234 : vector<8x32xf32>
    %236 = arith.index_cast %c5_i32 : i32 to index
    %c0_117 = arith.constant 0 : index
    %c0_118 = arith.constant 0 : index
    %237 = vector.load %arg11[%236, %c0_117, %c0_118] : memref<8x8x32xf32, #tpu.memory_space<vmem>>, vector<1x8x32xf32>
    %238 = vector.shape_cast %237 : vector<1x8x32xf32> to vector<8x32xf32>
    %239 = arith.addf %238, %225 : vector<8x32xf32>
    %240 = arith.negf %239 : vector<8x32xf32>
    %241 = math.exp %240 : vector<8x32xf32>
    %cst_119 = arith.constant 1.000000e+00 : f32
    %242 = vector.broadcast %cst_119 : f32 to vector<8x32xf32>
    %243 = arith.addf %242, %241 : vector<8x32xf32>
    %244 = arith.divf %242, %243 : vector<8x32xf32>
    %245 = arith.index_cast %c5_i32 : i32 to index
    %c0_120 = arith.constant 0 : index
    %c0_121 = arith.constant 0 : index
    %246 = vector.load %arg12[%245, %c0_120, %c0_121] : memref<8x8x32xf32, #tpu.memory_space<vmem>>, vector<1x8x32xf32>
    %247 = vector.shape_cast %246 : vector<1x8x32xf32> to vector<8x32xf32>
    %248 = arith.addf %226, %37 : vector<8x32xf32>
    %249 = arith.mulf %235, %248 : vector<8x32xf32>
    %250 = arith.addf %247, %249 : vector<8x32xf32>
    %251 = math.tanh %250 : vector<8x32xf32>
    %cst_122 = arith.constant 1.000000e+00 : f32
    %252 = vector.broadcast %cst_122 : f32 to vector<8x32xf32>
    %253 = arith.subf %252, %244 : vector<8x32xf32>
    %254 = arith.mulf %253, %251 : vector<8x32xf32>
    %255 = arith.mulf %244, %219 : vector<8x32xf32>
    %256 = arith.addf %254, %255 : vector<8x32xf32>
    %257 = arith.index_cast %c5_i32 : i32 to index
    %c0_123 = arith.constant 0 : index
    %c0_124 = arith.constant 0 : index
    %258 = vector.load %arg13[%257, %c0_123, %c0_124] : memref<8x8x32xf32, #tpu.memory_space<vmem>>, vector<1x8x32xf32>
    %259 = vector.shape_cast %258 : vector<1x8x32xf32> to vector<8x32xf32>
    %260 = vector.shape_cast %256 : vector<8x32xf32> to vector<1x8x32xf32>
    tpu.vector_store %arg13[%257, %c0_123, %c0_124], %260 {strides = array<i32>} : memref<8x8x32xf32, #tpu.memory_space<vmem>>, vector<1x8x32xf32>,
    %c6_i32 = arith.constant 6 : i32
    %cst_125 = arith.constant dense<0.000000e+00> : vector<8x32xf32>
    %261 = tpu.matmul %256, %30, %cst_125 {dimension_numbers = #tpu.dot_dimension_numbers<[1], [0], [0], [1], [0, 0, 1, 1], [], []>} : vector<8x32xf32>, vector<32x32xf32>, vector<8x32xf32> -> vector<8x32xf32>
    %cst_126 = arith.constant dense<0.000000e+00> : vector<8x32xf32>
    %262 = tpu.matmul %256, %32, %cst_126 {dimension_numbers = #tpu.dot_dimension_numbers<[1], [0], [0], [1], [0, 0, 1, 1], [], []>} : vector<8x32xf32>, vector<32x32xf32>, vector<8x32xf32> -> vector<8x32xf32>
    %cst_127 = arith.constant dense<0.000000e+00> : vector<8x32xf32>
    %263 = tpu.matmul %256, %34, %cst_127 {dimension_numbers = #tpu.dot_dimension_numbers<[1], [0], [0], [1], [0, 0, 1, 1], [], []>} : vector<8x32xf32>, vector<32x32xf32>, vector<8x32xf32> -> vector<8x32xf32>
    %264 = arith.index_cast %c6_i32 : i32 to index
    %c0_128 = arith.constant 0 : index
    %c0_129 = arith.constant 0 : index
    %265 = vector.load %arg10[%264, %c0_128, %c0_129] : memref<8x8x32xf32, #tpu.memory_space<vmem>>, vector<1x8x32xf32>
    %266 = vector.shape_cast %265 : vector<1x8x32xf32> to vector<8x32xf32>
    %267 = arith.addf %266, %261 : vector<8x32xf32>
    %268 = arith.negf %267 : vector<8x32xf32>
    %269 = math.exp %268 : vector<8x32xf32>
    %cst_130 = arith.constant 1.000000e+00 : f32
    %270 = vector.broadcast %cst_130 : f32 to vector<8x32xf32>
    %271 = arith.addf %270, %269 : vector<8x32xf32>
    %272 = arith.divf %270, %271 : vector<8x32xf32>
    %273 = arith.index_cast %c6_i32 : i32 to index
    %c0_131 = arith.constant 0 : index
    %c0_132 = arith.constant 0 : index
    %274 = vector.load %arg11[%273, %c0_131, %c0_132] : memref<8x8x32xf32, #tpu.memory_space<vmem>>, vector<1x8x32xf32>
    %275 = vector.shape_cast %274 : vector<1x8x32xf32> to vector<8x32xf32>
    %276 = arith.addf %275, %262 : vector<8x32xf32>
    %277 = arith.negf %276 : vector<8x32xf32>
    %278 = math.exp %277 : vector<8x32xf32>
    %cst_133 = arith.constant 1.000000e+00 : f32
    %279 = vector.broadcast %cst_133 : f32 to vector<8x32xf32>
    %280 = arith.addf %279, %278 : vector<8x32xf32>
    %281 = arith.divf %279, %280 : vector<8x32xf32>
    %282 = arith.index_cast %c6_i32 : i32 to index
    %c0_134 = arith.constant 0 : index
    %c0_135 = arith.constant 0 : index
    %283 = vector.load %arg12[%282, %c0_134, %c0_135] : memref<8x8x32xf32, #tpu.memory_space<vmem>>, vector<1x8x32xf32>
    %284 = vector.shape_cast %283 : vector<1x8x32xf32> to vector<8x32xf32>
    %285 = arith.addf %263, %37 : vector<8x32xf32>
    %286 = arith.mulf %272, %285 : vector<8x32xf32>
    %287 = arith.addf %284, %286 : vector<8x32xf32>
    %288 = math.tanh %287 : vector<8x32xf32>
    %cst_136 = arith.constant 1.000000e+00 : f32
    %289 = vector.broadcast %cst_136 : f32 to vector<8x32xf32>
    %290 = arith.subf %289, %281 : vector<8x32xf32>
    %291 = arith.mulf %290, %288 : vector<8x32xf32>
    %292 = arith.mulf %281, %256 : vector<8x32xf32>
    %293 = arith.addf %291, %292 : vector<8x32xf32>
    %294 = arith.index_cast %c6_i32 : i32 to index
    %c0_137 = arith.constant 0 : index
    %c0_138 = arith.constant 0 : index
    %295 = vector.load %arg13[%294, %c0_137, %c0_138] : memref<8x8x32xf32, #tpu.memory_space<vmem>>, vector<1x8x32xf32>
    %296 = vector.shape_cast %295 : vector<1x8x32xf32> to vector<8x32xf32>
    %297 = vector.shape_cast %293 : vector<8x32xf32> to vector<1x8x32xf32>
    tpu.vector_store %arg13[%294, %c0_137, %c0_138], %297 {strides = array<i32>} : memref<8x8x32xf32, #tpu.memory_space<vmem>>, vector<1x8x32xf32>,
    %c7_i32 = arith.constant 7 : i32
    %cst_139 = arith.constant dense<0.000000e+00> : vector<8x32xf32>
    %298 = tpu.matmul %293, %30, %cst_139 {dimension_numbers = #tpu.dot_dimension_numbers<[1], [0], [0], [1], [0, 0, 1, 1], [], []>} : vector<8x32xf32>, vector<32x32xf32>, vector<8x32xf32> -> vector<8x32xf32>
    %cst_140 = arith.constant dense<0.000000e+00> : vector<8x32xf32>
    %299 = tpu.matmul %293, %32, %cst_140 {dimension_numbers = #tpu.dot_dimension_numbers<[1], [0], [0], [1], [0, 0, 1, 1], [], []>} : vector<8x32xf32>, vector<32x32xf32>, vector<8x32xf32> -> vector<8x32xf32>
    %cst_141 = arith.constant dense<0.000000e+00> : vector<8x32xf32>
    %300 = tpu.matmul %293, %34, %cst_141 {dimension_numbers = #tpu.dot_dimension_numbers<[1], [0], [0], [1], [0, 0, 1, 1], [], []>} : vector<8x32xf32>, vector<32x32xf32>, vector<8x32xf32> -> vector<8x32xf32>
    %301 = arith.index_cast %c7_i32 : i32 to index
    %c0_142 = arith.constant 0 : index
    %c0_143 = arith.constant 0 : index
    %302 = vector.load %arg10[%301, %c0_142, %c0_143] : memref<8x8x32xf32, #tpu.memory_space<vmem>>, vector<1x8x32xf32>
    %303 = vector.shape_cast %302 : vector<1x8x32xf32> to vector<8x32xf32>
    %304 = arith.addf %303, %298 : vector<8x32xf32>
    %305 = arith.negf %304 : vector<8x32xf32>
    %306 = math.exp %305 : vector<8x32xf32>
    %cst_144 = arith.constant 1.000000e+00 : f32
    %307 = vector.broadcast %cst_144 : f32 to vector<8x32xf32>
    %308 = arith.addf %307, %306 : vector<8x32xf32>
    %309 = arith.divf %307, %308 : vector<8x32xf32>
    %310 = arith.index_cast %c7_i32 : i32 to index
    %c0_145 = arith.constant 0 : index
    %c0_146 = arith.constant 0 : index
    %311 = vector.load %arg11[%310, %c0_145, %c0_146] : memref<8x8x32xf32, #tpu.memory_space<vmem>>, vector<1x8x32xf32>
    %312 = vector.shape_cast %311 : vector<1x8x32xf32> to vector<8x32xf32>
    %313 = arith.addf %312, %299 : vector<8x32xf32>
    %314 = arith.negf %313 : vector<8x32xf32>
    %315 = math.exp %314 : vector<8x32xf32>
    %cst_147 = arith.constant 1.000000e+00 : f32
    %316 = vector.broadcast %cst_147 : f32 to vector<8x32xf32>
    %317 = arith.addf %316, %315 : vector<8x32xf32>
    %318 = arith.divf %316, %317 : vector<8x32xf32>
    %319 = arith.index_cast %c7_i32 : i32 to index
    %c0_148 = arith.constant 0 : index
    %c0_149 = arith.constant 0 : index
    %320 = vector.load %arg12[%319, %c0_148, %c0_149] : memref<8x8x32xf32, #tpu.memory_space<vmem>>, vector<1x8x32xf32>
    %321 = vector.shape_cast %320 : vector<1x8x32xf32> to vector<8x32xf32>
    %322 = arith.addf %300, %37 : vector<8x32xf32>
    %323 = arith.mulf %309, %322 : vector<8x32xf32>
    %324 = arith.addf %321, %323 : vector<8x32xf32>
    %325 = math.tanh %324 : vector<8x32xf32>
    %cst_150 = arith.constant 1.000000e+00 : f32
    %326 = vector.broadcast %cst_150 : f32 to vector<8x32xf32>
    %327 = arith.subf %326, %318 : vector<8x32xf32>
    %328 = arith.mulf %327, %325 : vector<8x32xf32>
    %329 = arith.mulf %318, %293 : vector<8x32xf32>
    %330 = arith.addf %328, %329 : vector<8x32xf32>
    %331 = arith.index_cast %c7_i32 : i32 to index
    %c0_151 = arith.constant 0 : index
    %c0_152 = arith.constant 0 : index
    %332 = vector.load %arg13[%331, %c0_151, %c0_152] : memref<8x8x32xf32, #tpu.memory_space<vmem>>, vector<1x8x32xf32>
    %333 = vector.shape_cast %332 : vector<1x8x32xf32> to vector<8x32xf32>
    %334 = vector.shape_cast %330 : vector<8x32xf32> to vector<1x8x32xf32>
    tpu.vector_store %arg13[%331, %c0_151, %c0_152], %334 {strides = array<i32>} : memref<8x8x32xf32, #tpu.memory_space<vmem>>, vector<1x8x32xf32>,
    %c8_i32 = arith.constant 8 : i32
    %c0_153 = arith.constant 0 : index
    %c0_154 = arith.constant 0 : index
    %c0_155 = arith.constant 0 : index
    %335 = vector.load %arg13[%c0_153, %c0_154, %c0_155] : memref<8x8x32xf32, #tpu.memory_space<vmem>>, vector<8x8x32xf32>
    %336 = vector.shape_cast %335 : vector<8x8x32xf32> to vector<64x32xf32>
    %c0_156 = arith.constant 0 : index
    %c0_157 = arith.constant 0 : index
    %337 = vector.load %arg6[%c0_156, %c0_157] : memref<32x8xf32, #tpu.memory_space<vmem>>, vector<32x8xf32>
    %cst_158 = arith.constant dense<0.000000e+00> : vector<64x8xf32>
    %338 = tpu.matmul %336, %337, %cst_158 {dimension_numbers = #tpu.dot_dimension_numbers<[1], [0], [0], [1], [0, 0, 1, 1], [], []>} : vector<64x32xf32>, vector<32x8xf32>, vector<64x8xf32> -> vector<64x8xf32>
    %c0_159 = arith.constant 0 : index
    %c0_160 = arith.constant 0 : index
    %339 = vector.load %arg7[%c0_159, %c0_160] : memref<1x8xf32, #tpu.memory_space<vmem>>, vector<1x8xf32>
    %340 = vector.broadcast %339 : vector<1x8xf32> to vector<64x8xf32>
    %341 = arith.addf %338, %340 : vector<64x8xf32>
    %c0_161 = arith.constant 0 : index
    %c0_162 = arith.constant 0 : index
    %342 = vector.load %arg8[%c0_161, %c0_162] : memref<64x8xf32, #tpu.memory_space<vmem>>, vector<64x8xf32>
    tpu.vector_store %arg8[%c0_161, %c0_162], %341 {strides = array<i32>} : memref<64x8xf32, #tpu.memory_space<vmem>>, vector<64x8xf32>,
    %c0_163 = arith.constant 0 : index
    %c0_164 = arith.constant 0 : index
    %343 = vector.load %arg9[%c0_163, %c0_164] : memref<8x32xf32, #tpu.memory_space<vmem>>, vector<8x32xf32>
    tpu.vector_store %arg9[%c0_163, %c0_164], %330 {strides = array<i32>} : memref<8x32xf32, #tpu.memory_space<vmem>>, vector<8x32xf32>,
    return
  }
  func.func @transform_0(%arg0: i32) -> (i32, i32, i32) {
    %c0_i32 = arith.constant 0 : i32
    %c0_i32_0 = arith.constant 0 : i32
    %c0_i32_1 = arith.constant 0 : i32
    %c0_i32_2 = arith.constant 0 : i32
    return %c0_i32, %c0_i32_0, %c0_i32_1 : i32, i32, i32
  }
  func.func @transform_1(%arg0: i32) -> (i32, i32, i32) {
    %c0_i32 = arith.constant 0 : i32
    %c0_i32_0 = arith.constant 0 : i32
    %c0_i32_1 = arith.constant 0 : i32
    %c0_i32_2 = arith.constant 0 : i32
    return %c0_i32, %c0_i32_0, %c0_i32_1 : i32, i32, i32
  }
  func.func @transform_2(%arg0: i32) -> (i32, i32, i32) {
    %c0_i32 = arith.constant 0 : i32
    %c0_i32_0 = arith.constant 0 : i32
    %c0_i32_1 = arith.constant 0 : i32
    %c0_i32_2 = arith.constant 0 : i32
    return %c0_i32, %c0_i32_0, %c0_i32_1 : i32, i32, i32
  }
  func.func @transform_3(%arg0: i32) -> (i32, i32, i32) {
    %c0_i32 = arith.constant 0 : i32
    %c0_i32_0 = arith.constant 0 : i32
    %c0_i32_1 = arith.constant 0 : i32
    %c0_i32_2 = arith.constant 0 : i32
    return %c0_i32, %c0_i32_0, %c0_i32_1 : i32, i32, i32
  }
  func.func @transform_4(%arg0: i32) -> (i32, i32) {
    %c0_i32 = arith.constant 0 : i32
    %c0_i32_0 = arith.constant 0 : i32
    %c0_i32_1 = arith.constant 0 : i32
    return %c0_i32, %c0_i32_0 : i32, i32
  }
  func.func @transform_5(%arg0: i32) -> (i32, i32) {
    %c0_i32 = arith.constant 0 : i32
    %c0_i32_0 = arith.constant 0 : i32
    %c0_i32_1 = arith.constant 0 : i32
    return %c0_i32, %c0_i32_0 : i32, i32
  }
  func.func @transform_6(%arg0: i32) -> (i32, i32) {
    %c0_i32 = arith.constant 0 : i32
    %c0_i32_0 = arith.constant 0 : i32
    %c0_i32_1 = arith.constant 0 : i32
    return %c0_i32, %c0_i32_0 : i32, i32
  }
  func.func @transform_7(%arg0: i32) -> (i32, i32) {
    %c0_i32 = arith.constant 0 : i32
    %c0_i32_0 = arith.constant 0 : i32
    %c0_i32_1 = arith.constant 0 : i32
    return %c0_i32, %c0_i32_0 : i32, i32
  }
  func.func @transform_8(%arg0: i32) -> (i32, i32) {
    %c0_i32 = arith.constant 0 : i32
    %c0_i32_0 = arith.constant 0 : i32
    %c0_i32_1 = arith.constant 0 : i32
    return %c0_i32, %c0_i32_0 : i32, i32
  }
}

</mosaic_0001>

<bundles_post_ra>
// kernel: gru_forward.1
= control target key start
LH: loop header
LB: loop body
LE: loop exit
PB: predicated region body
PF: predicated region fallthrough
CT: control target
= control target key end

     0   :  { %vm45_vm0 = vcmask 130048   ;;  %v3382_v18 = vmov 0.0|0.0   ;;  %vm3383_vm1 = vmmov 0   ;;  %v3384_v32 = vmov 0.0   ;;  %s3832_s1 = inlined_call_operand.vmem [shape: f32[3,16,32], index: 1, kind: input, shape index: {}]   ;;  %s3833_s0 = inlined_call_operand.vmem [shape: f32[8,8,16], index: 0, kind: input, shape index: {}]   ;;  %s3834_s2 = inlined_call_operand.vmem [shape: f32[3,32,32], index: 2, kind: input, shape index: {}]   ;;  %s3835_s3 = inlined_call_operand.vmem [shape: f32[3,1,32], index: 3, kind: input, shape index: {}]   ;;  %s3836_s4 = inlined_call_operand.vmem [shape: f32[1,32], index: 4, kind: input, shape index: {}]   ;;  %s3837_s5 = inlined_call_operand.vmem [shape: f32[32,8], index: 5, kind: input, shape index: {}]   ;;  %s3838_s6 = inlined_call_operand.vmem [shape: f32[1,8], index: 6, kind: input, shape index: {}]   ;;  %s3839_s7 = inlined_call_operand.vmem [shape: f32[64,8], index: 7, kind: output, shape index: {0}]   ;;  %s3840_s8 = inlined_call_operand.vmem [shape: f32[8,32], index: 8, kind: output, shape index: {1}]  }
   0x1   :  { %v36_v0 = vld [vmem:[%s3832_s1] sm:$0xff]  ;;  %v37_v1 = vld [vmem:[%s3832_s1 + $0x8] sm:$0xff]  ;;  %v30_v2 = vld [vmem:[%s3833_s0 + $0x10] sm:$0xff]  ;;  %vm175_vm2 = vcmask 261120   ;;  %vm2533_vm3 = vcmask 64512  }
   0x2   :  { %v3133_v3 = vpack.c.bf16 %v37_v1, %v36_v0  ;;  %2808 = vmatprep.mubr.msk.f32.mxu1 %vm45_vm0, %v30_v2  ;;  %v2560_v4 = vld [vmem:[%s3832_s1 + $0x10] sm:$0xff]  ;;  %v2561_v5 = vld [vmem:[%s3832_s1 + $0x18] sm:$0xff]  ;;  %v28_v8 = vld [vmem:[%s3833_s0] sm:$0xff] }
   0x3   :  { %v3137_v6 = vpack.c.bf16 %v2561_v5, %v2560_v4  ;;  %v31_v7 = vld [vmem:[%s3833_s0 + $0x18] sm:$0xff]  ;;  %v32_v9 = vld [vmem:[%s3833_s0 + $0x20] sm:$0xff]  ;;  %2805 = vmatprep.mubr.msk.f32.mxu0 %vm45_vm0, %v28_v8  ;;  %v29_v10 = vld [vmem:[%s3833_s0 + $0x8] sm:$0xff] }
   0x4   :  { %3297 = vmatprep.subr.bf16.mxu1 %v3133_v3  ;;  %3134 = vmatprep.subr.bf16.mxu0 %v3133_v3  ;;  %v2572_v11 = vld [vmem:[%s3832_s1 + $0x20] sm:$0xff]  ;;  %v2573_v12 = vld [vmem:[%s3832_s1 + $0x28] sm:$0xff]  ;;  %v34_v17 = vld [vmem:[%s3833_s0 + $0x30] sm:$0xff] }
   0x5   :  { %3298 = vmatpush3.bf16.msra.mxu1 %v3133_v3  ;;  %3136 = vmatpush3.bf16.msra.mxu0 %v3133_v3  ;;  %v33_v13 = vld [vmem:[%s3833_s0 + $0x28] sm:$0xff]  ;;  %v3141_v14 = vpack.c.bf16 %v2573_v12, %v2572_v11  ;;  %v2588_v15 = vld [vmem:[%s3834_s2 + $0x40] sm:$0xff]  ;;  %v35_v20 = vld [vmem:[%s3833_s0 + $0x38] sm:$0xff] }
   0x6   :  { %3138 = vmatprep.subr.bf16.mxu1 %v3137_v6  ;;  %v2589_v16 = vld [vmem:[%s3834_s2 + $0x48] sm:$0xff]  ;;  %v432_v21 = vld [vmem:[%s3834_s2] sm:$0xff]  ;;  %v2590_v23 = vld [vmem:[%s3834_s2 + $0x50] sm:$0xff] }
   0x7   :  { %3142 = vmatprep.subr.bf16.mxu0 %v3141_v14  ;;  %v3483_v19 = vpack.c.bf16 %v2589_v16, %v2588_v15  ;;  %v433_v22 = vld [vmem:[%s3834_s2 + $0x8] sm:$0xff]  ;;  %v2591_v24 = vld [vmem:[%s3834_s2 + $0x58] sm:$0xff]  ;;  %v434_v26 = vld [vmem:[%s3834_s2 + $0x10] sm:$0xff] }
   0x8   :  { %2809 = vmatmul.mubr.msk.f32.vlgmr.msra.gmra.mrb[0].mxu1 %vm45_vm0, %v31_v7  ;;  %2806 = vmatmul.mubr.msk.f32.vlgmr.msra.gmra.mrb[0].mxu0 %vm45_vm0, %v29_v10  ;;  %v3506_v25 = vpack.c.bf16 %v433_v22, %v432_v21  ;;  %v435_v27 = vld [vmem:[%s3834_s2 + $0x18] sm:$0xff]  ;;  %v3516_v28 = vpack.c.bf16 %v2591_v24, %v2590_v23  ;;  %v2584_v30 = vld [vmem:[%s3834_s2 + $0x20] sm:$0xff]  ;;  %v2585_v31 = vld [vmem:[%s3834_s2 + $0x28] sm:$0xff] }
   0x9   :  { %3140 = vmatpush3.bf16.msra.mxu1 %v3137_v6  ;;  %2811 = vmatprep.mubr.msk.f32.mxu1 %vm45_vm0, %v32_v9  ;;  %v3523_v29 = vpack.c.bf16 %v435_v27, %v434_v26  ;;  %v3545_v33 = vpack.c.bf16 %v2585_v31, %v2584_v30  ;;  %v2586_v34 = vld [vmem:[%s3834_s2 + $0x30] sm:$0xff]  ;;  %v2587_v35 = vld [vmem:[%s3834_s2 + $0x38] sm:$0xff]  ;;  %v2551_v37 = vld [vmem:[%s3835_s3] ss:$0 sm:$0xff] }
   0xa   :  { %3145 = vmatprep.subr.bf16.mxu1 %v3382_v18  ;;  %2837 = vmatprep.mubr.msk.f32.mxu0 %vm45_vm0, %v28_v8  ;;  %v3559_v36 = vpack.c.bf16 %v2587_v35, %v2586_v34  ;;  %v2575_v49 = vld [vmem:[%s3835_s3 + $0x2] ss:$0 sm:$0xff]  ;;  %v2563_v59 = vld [vmem:[%s3835_s3 + $0x1] ss:$0 sm:$0xff] }
   0xb   :  { %3144 = vmatpush3.bf16.msra.mxu0 %v3141_v14 }
   0xc   :  { %2812 = vmatmul.mubr.msk.f32.gmra.mrb[2].mxu1 %vm45_vm0, %v33_v13  ;;  %3157 = vmatprep.subr.bf16.mxu0 %v3382_v18 }
   0xd   :  { %2814 = vmatprep.mubr.msk.f32.mxu1 %vm45_vm0, %v34_v17 }
   0xe   :  { %2838 = vmatmul.mubr.msk.f32.vlgmr.msra.gmra.mrb[2].mxu0 %vm45_vm0, %v29_v10 }
   0xf   :  { %3159 = vmatpush3.bf16.msra.mxu0 %v3483_v19  ;;  %2840 = vmatprep.mubr.msk.f32.mxu0 %vm45_vm0, %v30_v2 }
  0x10   :  { %2815 = vmatmul.mubr.msk.f32.gmra.mrb[4].mxu1 %vm45_vm0, %v35_v20  ;;  %3160 = vmatprep.subr.bf16.mxu0 %v3382_v18 }
  0x11   :  { %2821 = vmatprep.mubr.msk.f32.mxu1 %vm45_vm0, %v28_v8 }
  0x12   :  { %2841 = vmatmul.mubr.msk.f32.gmra.mrb[4].mxu0 %vm45_vm0, %v31_v7 }
  0x13   :  { %2843 = vmatprep.mubr.msk.f32.mxu0 %vm45_vm0, %v32_v9  ;;  %3162 = vmatpush3.bf16.msra.mxu0 %v3516_v28 }
  0x14   :  { %2822 = vmatmul.mubr.msk.f32.vlgmr.msra.gmra.mrb[6].mxu1 %vm45_vm0, %v29_v10  ;;  %3169 = vmatprep.subr.bf16.mxu0 %v3382_v18 }
  0x15   :  { %3147 = vmatpush3.bf16.msra.mxu1 %v3506_v25  ;;  %2824 = vmatprep.mubr.msk.f32.mxu1 %vm45_vm0, %v30_v2 }
  0x16   :  { %3148 = vmatprep.subr.bf16.mxu1 %v3382_v18  ;;  %2844 = vmatmul.mubr.msk.f32.gmra.mrb[6].mxu0 %vm45_vm0, %v33_v13 }
  0x17   :  { %2846 = vmatprep.mubr.msk.f32.mxu0 %vm45_vm0, %v34_v17 }
  0x18   :  { %2825 = vmatmul.mubr.msk.f32.gmra.mrb[8].mxu1 %vm45_vm0, %v31_v7 }
  0x19   :  { %2827 = vmatprep.mubr.msk.f32.mxu1 %vm45_vm0, %v32_v9  ;;  %3150 = vmatpush3.bf16.msra.mxu1 %v3523_v29 }
  0x1a   :  { %3151 = vmatprep.subr.bf16.mxu1 %v3382_v18  ;;  %2847 = vmatmul.mubr.msk.f32.gmra.mrb[8].mxu0 %vm45_vm0, %v35_v20 }
  0x1b   :  { %2879 = vmatprep.mubr.msk.f32.mxu0 %vm3383_vm1, %v3384_v32 }
  0x1c   :  { %2828 = vmatmul.mubr.msk.f32.gmra.mrb[10].mxu1 %vm45_vm0, %v33_v13 }
  0x1d   :  { %2830 = vmatprep.mubr.msk.f32.mxu1 %vm45_vm0, %v34_v17 }
  0x1e   :  { %2880 = vmatmul.mubr.f32.vlgmr.msra.gmra.mrb[10].mxu0 %v3384_v32 }
  0x1f   :  { %3171 = vmatpush3.bf16.msra.mxu0 %v3545_v33  ;;  %2901 = vmatprep.mubr.msk.f32.mxu0 %vm3383_vm1, %v3384_v32 }
  0x20   :  { %2831 = vmatmul.mubr.msk.f32.gmra.mrb[12].mxu1 %vm45_vm0, %v35_v20  ;;  %3172 = vmatprep.subr.bf16.mxu0 %v3382_v18 }
  0x21   :  { %2857 = vmatprep.mubr.msk.f32.mxu1 %vm3383_vm1, %v3384_v32 }
  0x23   :  { %3174 = vmatpush3.bf16.msra.mxu0 %v3559_v36 }
  0x24   :  { %2858 = vmatmul.mubr.f32.vlgmr.msra.gmra.mrb[14].mxu1 %v3384_v32  ;;  %3181 = vmatprep.subr.bf16.mxu0 %v3382_v18 }
  0x25   :  { %3153 = vmatpush3.bf16.msra.mxu1 %v3545_v33  ;;  %2868 = vmatprep.mubr.msk.f32.mxu1 %vm3383_vm1, %v3384_v32 }
  0x26   :  { %3154 = vmatprep.subr.bf16.mxu1 %v3382_v18 }
  0x29   :  { %3156 = vmatpush3.bf16.msra.mxu1 %v3559_v36 }
  0x2a   :  { %3163 = vmatprep.subr.bf16.mxu1 %v3382_v18 }
  0x2c   :  { %2869 = vmatmul.mubr.f32.vlgmr.msra.gmra.mrb[16].mxu1 %v3384_v32 }
  0x2d   :  { %3165 = vmatpush3.bf16.msra.mxu1 %v3506_v25  ;;  %2890 = vmatprep.mubr.msk.f32.mxu1 %vm3383_vm1, %v3384_v32 }
  0x2e   :  { %3166 = vmatprep.subr.bf16.mxu1 %v3382_v18 }
  0x31   :  { %3168 = vmatpush3.bf16.msra.mxu1 %v3523_v29 }
  0x32   :  { %3175 = vmatprep.subr.bf16.mxu1 %v3382_v18 }
  0xdb   :  { %v2810_v38 = vpop.f32.mrb[0].mxu1  ;;  %v2807_v39 = vpop.f32.mrb[0].mxu0 }
  0xdc   :  { %v152_v40 = vadd.f32 %v2810_v38, %v2551_v37  ;;  %v146_v41 = vpop.f32.mrb[1].mxu1  ;;  %v142_v42 = vadd.f32 %v2807_v39, %v2551_v37  ;;  %v136_v43 = vpop.f32.mrb[1].mxu0 }
  0xdd   :  { %v147_v44 = vadd.f32 %v2551_v37, %v146_v41  ;;  %v137_v45 = vadd.f32 %v2551_v37, %v136_v43 }
  0xde   :  { %179 = vst.msk [vmem:[#allocation2 + $0x18] sm:$0xff] %vm175_vm2, %v152_v40  ;;  %177 = vst.msk [vmem:[#allocation2 + $0x8] sm:$0xff] %vm175_vm2, %v142_v42 }
  0xdf   :  { %178 = vst.msk [vmem:[#allocation2 + $0x10] sm:$0xff] %vm175_vm2, %v147_v44  ;;  %v2813_v46 = vpop.f32.mrb[2].mxu1  ;;  %176 = vst.msk [vmem:[#allocation2] sm:$0xff] %vm175_vm2, %v137_v45 }
  0xe0   :  { %v162_v47 = vadd.f32 %v2813_v46, %v2551_v37  ;;  %v156_v48 = vpop.f32.mrb[3].mxu1  ;;  %v3615_v46 = vld [vmem:[%s3836_s4] ss:$0 sm:$0xff] }
  0xe1   :  { %v157_v50 = vadd.f32 %v2551_v37, %v156_v48  ;;  %v2839_v51 = vpop.f32.mrb[2].mxu0 }
  0xe2   :  { %181 = vst.msk [vmem:[#allocation2 + $0x28] sm:$0xff] %vm175_vm2, %v162_v47  ;;  %v391_v53 = vadd.f32 %v2839_v51, %v2575_v49  ;;  %v385_v54 = vpop.f32.mrb[3].mxu0 }
  0xe3   :  { %180 = vst.msk [vmem:[#allocation2 + $0x20] sm:$0xff] %vm175_vm2, %v157_v50  ;;  %v2816_v52 = vpop.f32.mrb[4].mxu1  ;;  %v386_v57 = vadd.f32 %v2575_v49, %v385_v54 }
  0xe4   :  { %v172_v55 = vadd.f32 %v2816_v52, %v2551_v37  ;;  %v166_v56 = vpop.f32.mrb[5].mxu1  ;;  %425 = vst.msk [vmem:[#allocation4 + $0x8] sm:$0xff] %vm175_vm2, %v391_v53 }
  0xe5   :  { %v167_v58 = vadd.f32 %v2551_v37, %v166_v56  ;;  %424 = vst.msk [vmem:[#allocation4] sm:$0xff] %vm175_vm2, %v386_v57  ;;  %v2842_v60 = vpop.f32.mrb[4].mxu0 }
  0xe6   :  { %183 = vst.msk [vmem:[#allocation2 + $0x38] sm:$0xff] %vm175_vm2, %v172_v55  ;;  %v401_v62 = vadd.f32 %v2842_v60, %v2575_v49  ;;  %v395_v63 = vpop.f32.mrb[5].mxu0  ;;  %v596_v31 = vld [vmem:[#allocation2] sm:$0xff] }
  0xe7   :  { %182 = vst.msk [vmem:[#allocation2 + $0x30] sm:$0xff] %vm175_vm2, %v167_v58  ;;  %v2823_v61 = vpop.f32.mrb[6].mxu1  ;;  %v396_v2 = vadd.f32 %v2575_v49, %v395_v63 }
  0xe8   :  { %v267_v0 = vadd.f32 %v2823_v61, %v2563_v59  ;;  %v261_v1 = vpop.f32.mrb[7].mxu1  ;;  %427 = vst.msk [vmem:[#allocation4 + $0x18] sm:$0xff] %vm175_vm2, %v401_v62  ;;  %v835_v61 = vld [vmem:[#allocation2 + $0x8] sm:$0xff] }
  0xe9   :  { %v262_v3 = vadd.f32 %v2563_v59, %v261_v1  ;;  %426 = vst.msk [vmem:[#allocation4 + $0x10] sm:$0xff] %vm175_vm2, %v396_v2  ;;  %v2845_v4 = vpop.f32.mrb[6].mxu0 }
  0xea   :  { %301 = vst.msk [vmem:[#allocation3 + $0x8] sm:$0xff] %vm175_vm2, %v267_v0  ;;  %v411_v6 = vadd.f32 %v2845_v4, %v2575_v49  ;;  %v405_v7 = vpop.f32.mrb[7].mxu0 }
  0xeb   :  { %300 = vst.msk [vmem:[#allocation3] sm:$0xff] %vm175_vm2, %v262_v3  ;;  %v2826_v5 = vpop.f32.mrb[8].mxu1  ;;  %v406_v10 = vadd.f32 %v2575_v49, %v405_v7 }
  0xec   :  { %v277_v8 = vadd.f32 %v2826_v5, %v2563_v59  ;;  %v271_v9 = vpop.f32.mrb[9].mxu1  ;;  %429 = vst.msk [vmem:[#allocation4 + $0x28] sm:$0xff] %vm175_vm2, %v411_v6  ;;  %v612_v52 = vld [vmem:[#allocation4] sm:$0xff] }
  0xed   :  { %v272_v11 = vadd.f32 %v2563_v59, %v271_v9  ;;  %428 = vst.msk [vmem:[#allocation4 + $0x20] sm:$0xff] %vm175_vm2, %v406_v10  ;;  %v2848_v12 = vpop.f32.mrb[8].mxu0 }
  0xee   :  { %303 = vst.msk [vmem:[#allocation3 + $0x18] sm:$0xff] %vm175_vm2, %v277_v8  ;;  %v421_v14 = vadd.f32 %v2848_v12, %v2575_v49  ;;  %v415_v15 = vpop.f32.mrb[9].mxu0 }
  0xef   :  { %302 = vst.msk [vmem:[#allocation3 + $0x10] sm:$0xff] %vm175_vm2, %v272_v11  ;;  %v2829_v13 = vpop.f32.mrb[10].mxu1  ;;  %v416_v20 = vadd.f32 %v2575_v49, %v415_v15  ;;  %v853_v15 = vld [vmem:[#allocation4 + $0x8] sm:$0xff] }
  0xf0   :  { %v287_v16 = vadd.f32 %v2829_v13, %v2563_v59  ;;  %v281_v17 = vpop.f32.mrb[11].mxu1  ;;  %431 = vst.msk [vmem:[#allocation4 + $0x38] sm:$0xff] %vm175_vm2, %v421_v14 }
  0xf1   :  { %v282_v21 = vadd.f32 %v2563_v59, %v281_v17  ;;  %430 = vst.msk [vmem:[#allocation4 + $0x30] sm:$0xff] %vm175_vm2, %v416_v20  ;;  %v679_v22 = vpop.f32.mrb[10].mxu0  ;;  %v844_v3 = vld [vmem:[#allocation3 + $0x8] sm:$0xff] }
  0xf2   :  { %305 = vst.msk [vmem:[#allocation3 + $0x28] sm:$0xff] %vm175_vm2, %v287_v16  ;;  %v2881_v24 = vpop.f32.mrb[11].mxu0  ;;  %v604_v40 = vld [vmem:[#allocation3] sm:$0xff]  ;;  %v680_v49 = vadd.f32 %v3615_v46, %v679_v22 }
  0xf3   :  { %304 = vst.msk [vmem:[#allocation3 + $0x20] sm:$0xff] %vm175_vm2, %v282_v21  ;;  %v2832_v23 = vpop.f32.mrb[12].mxu1 }
  0xf4   :  { %v297_v26 = vadd.f32 %v2832_v23, %v2563_v59  ;;  %v291_v27 = vpop.f32.mrb[13].mxu1 }
  0xf5   :  { %v292_v30 = vadd.f32 %v2563_v59, %v291_v27  ;;  %v1077_v27 = vld [vmem:[#allocation2 + $0x10] sm:$0xff] }
  0xf6   :  { %307 = vst.msk [vmem:[#allocation3 + $0x38] sm:$0xff] %vm175_vm2, %v297_v26 }
  0xf7   :  { %306 = vst.msk [vmem:[#allocation3 + $0x30] sm:$0xff] %vm175_vm2, %v292_v30  ;;  %v522_v34 = vpop.f32.mrb[14].mxu1 }
  0xf8   :  { %v597_v35 = vadd.f32 %v596_v31, %v522_v34  ;;  %v2859_v37 = vpop.f32.mrb[15].mxu1 }
  0xfa   :  { %v2593_v38 = vmul.f32 -1.442695, %v597_v35 }
  0xfc   :  { %3302 = vpow2.f32 %v2593_v38  ;;  %v1086_v38 = vld [vmem:[#allocation3 + $0x10] sm:$0xff] }
  0xff   :  { %v592_v39 = vpop.f32.mrb[16].mxu1 }
 0x100   :  { %v605_v41 = vadd.f32 %v604_v40, %v592_v39  ;;  %v2870_v42 = vpop.f32.mrb[17].mxu1 }
 0x102   :  { %v2594_v43 = vmul.f32 -1.442695, %v605_v41 }
 0x104   :  { %3304 = vpow2.f32 %v2594_v43 }
 0x106   :  { %v3303_v44 = vpop.eup %3302 }
 0x107   :  { %v601_v45 = vadd.f32 1.0, %v3303_v44 }
 0x109   :  { %3306 = vrcp.f32 %v601_v45 }
 0x10e   :  { %v3305_v47 = vpop.eup %3304 }
 0x10f   :  { %v609_v48 = vadd.f32 1.0, %v3305_v47 }
 0x111   :  { %3308 = vrcp.f32 %v609_v48 }
 0x113   :  { %v3307_v50 = vpop.eup %3306 }
 0x114   :  { %v683_v51 = vmul.f32 %v3307_v50, %v680_v49 }
 0x116   :  { %v684_v53 = vadd.f32 %v683_v51, %v612_v52  ;;  %v1095_v51 = vld [vmem:[#allocation4 + $0x10] sm:$0xff] }
 0x118   :  { %3310 = vtanh.f32 %v684_v53 }
 0x11b   :  { %v3309_v54 = vpop.eup %3308 }
 0x11c   :  { %v686_v55 = vsub.f32 1.0, %v3309_v54  ;;  %v688_v58 = vmul.f32 0.0, %v3309_v54 }
 0x122   :  { %v3311_v56 = vpop.eup %3310 }
 0x123   :  { %v687_v57 = vmul.f32 %v3311_v56, %v686_v55 }
 0x125   :  { %v689_v59 = vadd.f32 %v688_v58, %v687_v57 }
 0x127   :  { %690 = vst.msk [vmem:[#allocation5] sm:$0xff] %vm175_vm2, %v689_v59  ;;  %2891 = vmatmul.mubr.msk.f32.vlgmr.msra.gmra.mrb[18].mxu1 %vm175_vm2, %v689_v59  ;;  %2902 = vmatmul.mubr.msk.f32.vlgmr.msra.gmra.mrb[12].mxu0 %vm175_vm2, %v689_v59 }
 0x128   :  { %3177 = vmatpush3.bf16.msra.mxu1 %v3483_v19  ;;  %2912 = vmatprep.mubr.msk.f32.mxu1 %vm3383_vm1, %v3384_v32 }
 0x129   :  { %3178 = vmatprep.subr.bf16.mxu1 %v3382_v18  ;;  %3183 = vmatpush3.bf16.msra.mxu0 %v3506_v25 }
 0x12a   :  { %3184 = vmatprep.subr.bf16.mxu0 %v3382_v18  ;;  %2923 = vmatprep.mubr.msk.f32.mxu0 %vm3383_vm1, %v3384_v32 }
 0x12c   :  { %3180 = vmatpush3.bf16.msra.mxu1 %v3516_v28 }
 0x12d   :  { %3187 = vmatprep.subr.bf16.mxu1 %v3382_v18  ;;  %3186 = vmatpush3.bf16.msra.mxu0 %v3523_v29 }
 0x12e   :  { %3193 = vmatprep.subr.bf16.mxu0 %v3382_v18 }
 0x12f   :  { %2913 = vmatmul.mubr.msk.f32.vlgmr.msra.gmra.mrb[20].mxu1 %vm175_vm2, %v689_v59 }
 0x130   :  { %3189 = vmatpush3.bf16.msra.mxu1 %v3545_v33  ;;  %2934 = vmatprep.mubr.msk.f32.mxu1 %vm3383_vm1, %v3384_v32 }
 0x131   :  { %3190 = vmatprep.subr.bf16.mxu1 %v3382_v18 }
 0x134   :  { %3192 = vmatpush3.bf16.msra.mxu1 %v3559_v36 }
 0x135   :  { %3199 = vmatprep.subr.bf16.mxu1 %v3382_v18 }
 0x1fa   :  { %v760_v60 = vpop.f32.mrb[18].mxu1  ;;  %v830_v62 = vpop.f32.mrb[12].mxu0 }
 0x1fb   :  { %v836_v63 = vadd.f32 %v835_v61, %v760_v60  ;;  %v2892_v0 = vpop.f32.mrb[19].mxu1  ;;  %v2903_v1 = vpop.f32.mrb[13].mxu0  ;;  %v845_v4 = vadd.f32 %v844_v3, %v830_v62  ;;  %v1319_v60 = vld [vmem:[#allocation2 + $0x18] sm:$0xff] }
 0x1fd   :  { %v2597_v2 = vmul.f32 -1.442695, %v836_v63  ;;  %v2598_v5 = vmul.f32 -1.442695, %v845_v4 }
 0x1ff   :  { %3312 = vpow2.f32 %v2597_v2  ;;  %v1328_v2 = vld [vmem:[#allocation3 + $0x18] sm:$0xff] }
 0x200   :  { %3314 = vpow2.f32 %v2598_v5 }
 0x202   :  { %v920_v6 = vpop.f32.mrb[20].mxu1 }
 0x203   :  { %v2914_v7 = vpop.f32.mrb[21].mxu1  ;;  %v921_v12 = vadd.f32 %v3615_v46, %v920_v6 }
 0x209   :  { %v3313_v8 = vpop.eup %3312 }
 0x20a   :  { %v840_v9 = vadd.f32 1.0, %v3313_v8  ;;  %v3315_v10 = vpop.eup %3314 }
 0x20b   :  { %v849_v11 = vadd.f32 1.0, %v3315_v10 }
 0x20c   :  { %3316 = vrcp.f32 %v840_v9 }
 0x20d   :  { %3318 = vrcp.f32 %v849_v11 }
 0x216   :  { %v3317_v13 = vpop.eup %3316 }
 0x217   :  { %v924_v14 = vmul.f32 %v3317_v13, %v921_v12  ;;  %v3319_v17 = vpop.eup %3318 }
 0x218   :  { %v927_v20 = vsub.f32 1.0, %v3319_v17  ;;  %v929_v23 = vmul.f32 %v3319_v17, %v689_v59 }
 0x219   :  { %v925_v16 = vadd.f32 %v924_v14, %v853_v15  ;;  %v1337_v14 = vld [vmem:[#allocation4 + $0x18] sm:$0xff] }
 0x21b   :  { %3320 = vtanh.f32 %v925_v16 }
 0x225   :  { %v3321_v21 = vpop.eup %3320 }
 0x226   :  { %v928_v22 = vmul.f32 %v3321_v21, %v927_v20 }
 0x228   :  { %v930_v24 = vadd.f32 %v929_v23, %v928_v22 }
 0x22a   :  { %932 = vst.msk [vmem:[#allocation5 + $0x8] sm:$0xff] %vm175_vm2, %v930_v24  ;;  %2924 = vmatmul.mubr.msk.f32.vlgmr.msra.gmra.mrb[14].mxu0 %vm175_vm2, %v930_v24  ;;  %2935 = vmatmul.mubr.msk.f32.vlgmr.msra.gmra.mrb[22].mxu1 %vm175_vm2, %v930_v24 }
 0x22b   :  { %3195 = vmatpush3.bf16.msra.mxu0 %v3483_v19  ;;  %2945 = vmatprep.mubr.msk.f32.mxu0 %vm3383_vm1, %v3384_v32 }
 0x22c   :  { %3196 = vmatprep.subr.bf16.mxu0 %v3382_v18  ;;  %3201 = vmatpush3.bf16.msra.mxu1 %v3506_v25 }
 0x22d   :  { %3202 = vmatprep.subr.bf16.mxu1 %v3382_v18  ;;  %2956 = vmatprep.mubr.msk.f32.mxu1 %vm3383_vm1, %v3384_v32 }
 0x22f   :  { %3198 = vmatpush3.bf16.msra.mxu0 %v3516_v28 }
 0x230   :  { %3205 = vmatprep.subr.bf16.mxu0 %v3382_v18  ;;  %3204 = vmatpush3.bf16.msra.mxu1 %v3523_v29 }
 0x231   :  { %3211 = vmatprep.subr.bf16.mxu1 %v3382_v18 }
 0x232   :  { %2946 = vmatmul.mubr.msk.f32.vlgmr.msra.gmra.mrb[16].mxu0 %vm175_vm2, %v930_v24 }
 0x233   :  { %3207 = vmatpush3.bf16.msra.mxu0 %v3545_v33  ;;  %2967 = vmatprep.mubr.msk.f32.mxu0 %vm3383_vm1, %v3384_v32 }
 0x234   :  { %3208 = vmatprep.subr.bf16.mxu0 %v3382_v18 }
 0x237   :  { %3210 = vmatpush3.bf16.msra.mxu0 %v3559_v36 }
 0x238   :  { %3217 = vmatprep.subr.bf16.mxu0 %v3382_v18 }
 0x2fd   :  { %v1002_v26 = vpop.f32.mrb[14].mxu0  ;;  %v1072_v30 = vpop.f32.mrb[22].mxu1 }
 0x2fe   :  { %v1078_v31 = vadd.f32 %v1077_v27, %v1002_v26  ;;  %v2925_v34 = vpop.f32.mrb[15].mxu0  ;;  %v2936_v35 = vpop.f32.mrb[23].mxu1  ;;  %v1087_v39 = vadd.f32 %v1086_v38, %v1072_v30  ;;  %v1561_v26 = vld [vmem:[#allocation2 + $0x20] sm:$0xff] }
 0x300   :  { %v2602_v37 = vmul.f32 -1.442695, %v1078_v31  ;;  %v2603_v40 = vmul.f32 -1.442695, %v1087_v39 }
 0x302   :  { %3322 = vpow2.f32 %v2602_v37  ;;  %v1570_v37 = vld [vmem:[#allocation3 + $0x20] sm:$0xff] }
 0x303   :  { %3324 = vpow2.f32 %v2603_v40 }
 0x305   :  { %v1162_v41 = vpop.f32.mrb[16].mxu0 }
 0x306   :  { %v2947_v42 = vpop.f32.mrb[17].mxu0  ;;  %v1163_v48 = vadd.f32 %v3615_v46, %v1162_v41 }
 0x30c   :  { %v3323_v43 = vpop.eup %3322 }
 0x30d   :  { %v1082_v44 = vadd.f32 1.0, %v3323_v43  ;;  %v3325_v45 = vpop.eup %3324 }
 0x30e   :  { %v1091_v47 = vadd.f32 1.0, %v3325_v45 }
 0x30f   :  { %3326 = vrcp.f32 %v1082_v44 }
 0x310   :  { %3328 = vrcp.f32 %v1091_v47 }
 0x319   :  { %v3327_v49 = vpop.eup %3326 }
 0x31a   :  { %v1166_v50 = vmul.f32 %v3327_v49, %v1163_v48  ;;  %v3329_v53 = vpop.eup %3328 }
 0x31b   :  { %v1169_v54 = vsub.f32 1.0, %v3329_v53  ;;  %v1171_v57 = vmul.f32 %v3329_v53, %v930_v24 }
 0x31c   :  { %v1167_v52 = vadd.f32 %v1166_v50, %v1095_v51  ;;  %v1579_v50 = vld [vmem:[#allocation4 + $0x20] sm:$0xff] }
 0x31e   :  { %3330 = vtanh.f32 %v1167_v52 }
 0x328   :  { %v3331_v55 = vpop.eup %3330 }
 0x329   :  { %v1170_v56 = vmul.f32 %v3331_v55, %v1169_v54 }
 0x32b   :  { %v1172_v58 = vadd.f32 %v1171_v57, %v1170_v56 }
 0x32d   :  { %1174 = vst.msk [vmem:[#allocation5 + $0x10] sm:$0xff] %vm175_vm2, %v1172_v58  ;;  %2957 = vmatmul.mubr.msk.f32.vlgmr.msra.gmra.mrb[24].mxu1 %vm175_vm2, %v1172_v58  ;;  %2968 = vmatmul.mubr.msk.f32.vlgmr.msra.gmra.mrb[18].mxu0 %vm175_vm2, %v1172_v58 }
 0x32e   :  { %3213 = vmatpush3.bf16.msra.mxu1 %v3483_v19  ;;  %2978 = vmatprep.mubr.msk.f32.mxu1 %vm3383_vm1, %v3384_v32 }
 0x32f   :  { %3214 = vmatprep.subr.bf16.mxu1 %v3382_v18  ;;  %3219 = vmatpush3.bf16.msra.mxu0 %v3506_v25 }
 0x330   :  { %3220 = vmatprep.subr.bf16.mxu0 %v3382_v18  ;;  %2989 = vmatprep.mubr.msk.f32.mxu0 %vm3383_vm1, %v3384_v32 }
 0x332   :  { %3216 = vmatpush3.bf16.msra.mxu1 %v3516_v28 }
 0x333   :  { %3223 = vmatprep.subr.bf16.mxu1 %v3382_v18  ;;  %3222 = vmatpush3.bf16.msra.mxu0 %v3523_v29 }
 0x334   :  { %3229 = vmatprep.subr.bf16.mxu0 %v3382_v18 }
 0x335   :  { %2979 = vmatmul.mubr.msk.f32.vlgmr.msra.gmra.mrb[26].mxu1 %vm175_vm2, %v1172_v58 }
 0x336   :  { %3225 = vmatpush3.bf16.msra.mxu1 %v3545_v33  ;;  %3000 = vmatprep.mubr.msk.f32.mxu1 %vm3383_vm1, %v3384_v32 }
 0x337   :  { %3226 = vmatprep.subr.bf16.mxu1 %v3382_v18 }
 0x33a   :  { %3228 = vmatpush3.bf16.msra.mxu1 %v3559_v36 }
 0x33b   :  { %3235 = vmatprep.subr.bf16.mxu1 %v3382_v18 }
 0x400   :  { %v1244_v59 = vpop.f32.mrb[24].mxu1  ;;  %v1314_v61 = vpop.f32.mrb[18].mxu0 }
 0x401   :  { %v1320_v62 = vadd.f32 %v1319_v60, %v1244_v59  ;;  %v2958_v63 = vpop.f32.mrb[25].mxu1  ;;  %v2969_v0 = vpop.f32.mrb[19].mxu0  ;;  %v1329_v3 = vadd.f32 %v1328_v2, %v1314_v61  ;;  %v1803_v59 = vld [vmem:[#allocation2 + $0x28] sm:$0xff] }
 0x403   :  { %v2607_v1 = vmul.f32 -1.442695, %v1320_v62  ;;  %v2608_v4 = vmul.f32 -1.442695, %v1329_v3 }
 0x405   :  { %3332 = vpow2.f32 %v2607_v1  ;;  %v1812_v1 = vld [vmem:[#allocation3 + $0x28] sm:$0xff] }
 0x406   :  { %3334 = vpow2.f32 %v2608_v4 }
 0x408   :  { %v1404_v5 = vpop.f32.mrb[26].mxu1 }
 0x409   :  { %v2980_v6 = vpop.f32.mrb[27].mxu1  ;;  %v1405_v11 = vadd.f32 %v3615_v46, %v1404_v5 }
 0x40f   :  { %v3333_v7 = vpop.eup %3332 }
 0x410   :  { %v1324_v8 = vadd.f32 1.0, %v3333_v7  ;;  %v3335_v9 = vpop.eup %3334 }
 0x411   :  { %v1333_v10 = vadd.f32 1.0, %v3335_v9 }
 0x412   :  { %3336 = vrcp.f32 %v1324_v8 }
 0x413   :  { %3338 = vrcp.f32 %v1333_v10 }
 0x41c   :  { %v3337_v12 = vpop.eup %3336 }
 0x41d   :  { %v1408_v13 = vmul.f32 %v3337_v12, %v1405_v11  ;;  %v3339_v16 = vpop.eup %3338 }
 0x41e   :  { %v1411_v17 = vsub.f32 1.0, %v3339_v16  ;;  %v1413_v22 = vmul.f32 %v3339_v16, %v1172_v58 }
 0x41f   :  { %v1409_v15 = vadd.f32 %v1408_v13, %v1337_v14  ;;  %v1821_v13 = vld [vmem:[#allocation4 + $0x28] sm:$0xff] }
 0x421   :  { %3340 = vtanh.f32 %v1409_v15 }
 0x42b   :  { %v3341_v20 = vpop.eup %3340 }
 0x42c   :  { %v1412_v21 = vmul.f32 %v3341_v20, %v1411_v17 }
 0x42e   :  { %v1414_v23 = vadd.f32 %v1413_v22, %v1412_v21 }
 0x430   :  { %1416 = vst.msk [vmem:[#allocation5 + $0x18] sm:$0xff] %vm175_vm2, %v1414_v23  ;;  %2990 = vmatmul.mubr.msk.f32.vlgmr.msra.gmra.mrb[20].mxu0 %vm175_vm2, %v1414_v23  ;;  %3001 = vmatmul.mubr.msk.f32.vlgmr.msra.gmra.mrb[28].mxu1 %vm175_vm2, %v1414_v23 }
 0x431   :  { %3231 = vmatpush3.bf16.msra.mxu0 %v3483_v19  ;;  %3011 = vmatprep.mubr.msk.f32.mxu0 %vm3383_vm1, %v3384_v32 }
 0x432   :  { %3232 = vmatprep.subr.bf16.mxu0 %v3382_v18  ;;  %3237 = vmatpush3.bf16.msra.mxu1 %v3506_v25 }
 0x433   :  { %3238 = vmatprep.subr.bf16.mxu1 %v3382_v18  ;;  %3022 = vmatprep.mubr.msk.f32.mxu1 %vm3383_vm1, %v3384_v32 }
 0x435   :  { %3234 = vmatpush3.bf16.msra.mxu0 %v3516_v28 }
 0x436   :  { %3241 = vmatprep.subr.bf16.mxu0 %v3382_v18  ;;  %3240 = vmatpush3.bf16.msra.mxu1 %v3523_v29 }
 0x437   :  { %3247 = vmatprep.subr.bf16.mxu1 %v3382_v18 }
 0x438   :  { %3012 = vmatmul.mubr.msk.f32.vlgmr.msra.gmra.mrb[22].mxu0 %vm175_vm2, %v1414_v23 }
 0x439   :  { %3243 = vmatpush3.bf16.msra.mxu0 %v3545_v33  ;;  %3033 = vmatprep.mubr.msk.f32.mxu0 %vm3383_vm1, %v3384_v32 }
 0x43a   :  { %3244 = vmatprep.subr.bf16.mxu0 %v3382_v18 }
 0x43d   :  { %3246 = vmatpush3.bf16.msra.mxu0 %v3559_v36 }
 0x43e   :  { %3253 = vmatprep.subr.bf16.mxu0 %v3382_v18 }
 0x503   :  { %v1486_v24 = vpop.f32.mrb[20].mxu0  ;;  %v1556_v27 = vpop.f32.mrb[28].mxu1 }
 0x504   :  { %v1562_v30 = vadd.f32 %v1561_v26, %v1486_v24  ;;  %v2991_v31 = vpop.f32.mrb[21].mxu0  ;;  %v3002_v34 = vpop.f32.mrb[29].mxu1  ;;  %v1571_v38 = vadd.f32 %v1570_v37, %v1556_v27  ;;  %v2045_v26 = vld [vmem:[#allocation2 + $0x30] sm:$0xff] }
 0x506   :  { %v2612_v35 = vmul.f32 -1.442695, %v1562_v30  ;;  %v2613_v39 = vmul.f32 -1.442695, %v1571_v38 }
 0x508   :  { %3342 = vpow2.f32 %v2612_v35  ;;  %v2054_v35 = vld [vmem:[#allocation3 + $0x30] sm:$0xff] }
 0x509   :  { %3344 = vpow2.f32 %v2613_v39 }
 0x50b   :  { %v1646_v40 = vpop.f32.mrb[22].mxu0 }
 0x50c   :  { %v3013_v41 = vpop.f32.mrb[23].mxu0  ;;  %v1647_v47 = vadd.f32 %v3615_v46, %v1646_v40 }
 0x512   :  { %v3343_v42 = vpop.eup %3342 }
 0x513   :  { %v1566_v43 = vadd.f32 1.0, %v3343_v42  ;;  %v3345_v44 = vpop.eup %3344 }
 0x514   :  { %v1575_v45 = vadd.f32 1.0, %v3345_v44 }
 0x515   :  { %3346 = vrcp.f32 %v1566_v43 }
 0x516   :  { %3348 = vrcp.f32 %v1575_v45 }
 0x51f   :  { %v3347_v48 = vpop.eup %3346 }
 0x520   :  { %v1650_v49 = vmul.f32 %v3347_v48, %v1647_v47  ;;  %v3349_v52 = vpop.eup %3348  ;;  %v2063_v48 = vld [vmem:[#allocation4 + $0x30] sm:$0xff] }
 0x521   :  { %v1653_v53 = vsub.f32 1.0, %v3349_v52  ;;  %v1655_v56 = vmul.f32 %v3349_v52, %v1414_v23 }
 0x522   :  { %v1651_v51 = vadd.f32 %v1650_v49, %v1579_v50 }
 0x524   :  { %3350 = vtanh.f32 %v1651_v51 }
 0x52e   :  { %v3351_v54 = vpop.eup %3350 }
 0x52f   :  { %v1654_v55 = vmul.f32 %v3351_v54, %v1653_v53 }
 0x531   :  { %v1656_v57 = vadd.f32 %v1655_v56, %v1654_v55  ;;  %v2395_v55 = vld [vmem:[%s3837_s5 + $0x10] sm:$0xff]  ;;  %v2396_v56 = vld [vmem:[%s3837_s5 + $0x18] sm:$0xff] }
 0x533   :  { %1658 = vst.msk [vmem:[#allocation5 + $0x20] sm:$0xff] %vm175_vm2, %v1656_v57  ;;  %3023 = vmatmul.mubr.msk.f32.vlgmr.msra.gmra.mrb[30].mxu1 %vm175_vm2, %v1656_v57  ;;  %3034 = vmatmul.mubr.msk.f32.vlgmr.msra.gmra.mrb[24].mxu0 %vm175_vm2, %v1656_v57 }
 0x534   :  { %3249 = vmatpush3.bf16.msra.mxu1 %v3483_v19  ;;  %3044 = vmatprep.mubr.msk.f32.mxu1 %vm3383_vm1, %v3384_v32 }
 0x535   :  { %3250 = vmatprep.subr.bf16.mxu1 %v3382_v18  ;;  %3255 = vmatpush3.bf16.msra.mxu0 %v3506_v25 }
 0x536   :  { %3256 = vmatprep.subr.bf16.mxu0 %v3382_v18  ;;  %3055 = vmatprep.mubr.msk.f32.mxu0 %vm3383_vm1, %v3384_v32 }
 0x538   :  { %3252 = vmatpush3.bf16.msra.mxu1 %v3516_v28 }
 0x539   :  { %3259 = vmatprep.subr.bf16.mxu1 %v3382_v18  ;;  %3258 = vmatpush3.bf16.msra.mxu0 %v3523_v29 }
 0x53a   :  { %3265 = vmatprep.subr.bf16.mxu0 %v3382_v18 }
 0x53b   :  { %3045 = vmatmul.mubr.msk.f32.vlgmr.msra.gmra.mrb[32].mxu1 %vm175_vm2, %v1656_v57 }
 0x53c   :  { %3261 = vmatpush3.bf16.msra.mxu1 %v3545_v33  ;;  %3066 = vmatprep.mubr.msk.f32.mxu1 %vm3383_vm1, %v3384_v32 }
 0x53d   :  { %3262 = vmatprep.subr.bf16.mxu1 %v3382_v18 }
 0x540   :  { %3264 = vmatpush3.bf16.msra.mxu1 %v3559_v36 }
 0x541   :  { %3271 = vmatprep.subr.bf16.mxu1 %v3382_v18 }
 0x606   :  { %v1728_v58 = vpop.f32.mrb[30].mxu1  ;;  %v1798_v60 = vpop.f32.mrb[24].mxu0 }
 0x607   :  { %v1804_v61 = vadd.f32 %v1803_v59, %v1728_v58  ;;  %v3024_v62 = vpop.f32.mrb[31].mxu1  ;;  %v3035_v63 = vpop.f32.mrb[25].mxu0  ;;  %v1813_v2 = vadd.f32 %v1812_v1, %v1798_v60  ;;  %v3293_v58 = vpack.c.bf16 %v2396_v56, %v2395_v55  ;;  %v2385_v59 = vld [vmem:[#allocation5] sm:$0xff]  ;;  %v2386_v60 = vld [vmem:[#allocation5 + $0x8] sm:$0xff] }
 0x608   :  { %v2287_v63 = vld [vmem:[#allocation2 + $0x38] sm:$0xff] }
 0x609   :  { %v2617_v0 = vmul.f32 -1.442695, %v1804_v61  ;;  %v2618_v3 = vmul.f32 -1.442695, %v1813_v2  ;;  %v2388_v61 = vld [vmem:[#allocation5 + $0x18] sm:$0xff] }
 0x60b   :  { %3352 = vpow2.f32 %v2617_v0 }
 0x60c   :  { %3354 = vpow2.f32 %v2618_v3 }
 0x60e   :  { %v1888_v4 = vpop.f32.mrb[32].mxu1 }
 0x60f   :  { %v3046_v5 = vpop.f32.mrb[33].mxu1  ;;  %v1889_v10 = vadd.f32 %v3615_v46, %v1888_v4 }
 0x610   :  { %v2296_v5 = vld [vmem:[#allocation3 + $0x38] sm:$0xff] }
 0x615   :  { %v3353_v6 = vpop.eup %3352 }
 0x616   :  { %v1808_v7 = vadd.f32 1.0, %v3353_v6  ;;  %v3355_v8 = vpop.eup %3354 }
 0x617   :  { %v1817_v9 = vadd.f32 1.0, %v3355_v8 }
 0x618   :  { %3356 = vrcp.f32 %v1808_v7  ;;  %v2630_v7 = vld [vmem:[%s3838_s6] ss:$0 sm:$0xff] }
 0x619   :  { %3358 = vrcp.f32 %v1817_v9 }
 0x622   :  { %v3357_v11 = vpop.eup %3356 }
 0x623   :  { %v1892_v12 = vmul.f32 %v3357_v11, %v1889_v10  ;;  %v3359_v15 = vpop.eup %3358 }
 0x624   :  { %v1895_v16 = vsub.f32 1.0, %v3359_v15  ;;  %v1897_v21 = vmul.f32 %v3359_v15, %v1656_v57 }
 0x625   :  { %v1893_v14 = vadd.f32 %v1892_v12, %v1821_v13 }
 0x627   :  { %3360 = vtanh.f32 %v1893_v14 }
 0x631   :  { %v3361_v17 = vpop.eup %3360 }
 0x632   :  { %v1896_v20 = vmul.f32 %v3361_v17, %v1895_v16 }
 0x634   :  { %v1898_v22 = vadd.f32 %v1897_v21, %v1896_v20 }
 0x636   :  { %1900 = vst.msk [vmem:[#allocation5 + $0x28] sm:$0xff] %vm175_vm2, %v1898_v22  ;;  %3056 = vmatmul.mubr.msk.f32.vlgmr.msra.gmra.mrb[26].mxu0 %vm175_vm2, %v1898_v22  ;;  %3067 = vmatmul.mubr.msk.f32.vlgmr.msra.gmra.mrb[34].mxu1 %vm175_vm2, %v1898_v22 }
 0x637   :  { %3267 = vmatpush3.bf16.msra.mxu0 %v3483_v19  ;;  %3077 = vmatprep.mubr.msk.f32.mxu0 %vm3383_vm1, %v3384_v32 }
 0x638   :  { %3268 = vmatprep.subr.bf16.mxu0 %v3382_v18  ;;  %3273 = vmatpush3.bf16.msra.mxu1 %v3506_v25  ;;  %v2393_v25 = vld [vmem:[%s3837_s5] sm:$0xff] }
 0x639   :  { %3274 = vmatprep.subr.bf16.mxu1 %v3382_v18  ;;  %3088 = vmatprep.mubr.msk.f32.mxu1 %vm3383_vm1, %v3384_v32 }
 0x63b   :  { %3270 = vmatpush3.bf16.msra.mxu0 %v3516_v28 }
 0x63c   :  { %3277 = vmatprep.subr.bf16.mxu0 %v3382_v18  ;;  %3276 = vmatpush3.bf16.msra.mxu1 %v3523_v29  ;;  %v2394_v29 = vld [vmem:[%s3837_s5 + $0x8] sm:$0xff] }
 0x63d   :  { %3283 = vmatprep.subr.bf16.mxu1 %v3382_v18  ;;  %v3289_v23 = vpack.c.bf16 %v2394_v29, %v2393_v25  ;;  %v2390_v62 = vld [vmem:[#allocation5 + $0x28] sm:$0xff] }
 0x63e   :  { %3078 = vmatmul.mubr.msk.f32.vlgmr.msra.gmra.mrb[28].mxu0 %vm175_vm2, %v1898_v22 }
 0x63f   :  { %3279 = vmatpush3.bf16.msra.mxu0 %v3545_v33  ;;  %3099 = vmatprep.mubr.msk.f32.mxu0 %vm3383_vm1, %v3384_v32 }
 0x640   :  { %3280 = vmatprep.subr.bf16.mxu0 %v3382_v18 }
 0x643   :  { %3282 = vmatpush3.bf16.msra.mxu0 %v3559_v36 }
 0x644   :  { %3290 = vmatprep.subr.bf16.mxu0 %v3289_v23 }
 0x709   :  { %v1970_v24 = vpop.f32.mrb[26].mxu0  ;;  %v2040_v33 = vpop.f32.mrb[34].mxu1 }
 0x70a   :  { %v2046_v27 = vadd.f32 %v2045_v26, %v1970_v24  ;;  %v3057_v30 = vpop.f32.mrb[27].mxu0  ;;  %v3068_v31 = vpop.f32.mrb[35].mxu1  ;;  %v2055_v37 = vadd.f32 %v2054_v35, %v2040_v33 }
 0x70c   :  { %v2622_v34 = vmul.f32 -1.442695, %v2046_v27  ;;  %v2623_v36 = vmul.f32 -1.442695, %v2055_v37 }
 0x70e   :  { %3362 = vpow2.f32 %v2622_v34  ;;  %v2305_v34 = vld [vmem:[#allocation4 + $0x38] sm:$0xff] }
 0x70f   :  { %3364 = vpow2.f32 %v2623_v36 }
 0x711   :  { %v2130_v38 = vpop.f32.mrb[28].mxu0 }
 0x712   :  { %v3079_v39 = vpop.f32.mrb[29].mxu0  ;;  %v2131_v44 = vadd.f32 %v3615_v46, %v2130_v38 }
 0x718   :  { %v3363_v40 = vpop.eup %3362 }
 0x719   :  { %v2050_v41 = vadd.f32 1.0, %v3363_v40  ;;  %v3365_v42 = vpop.eup %3364 }
 0x71a   :  { %v2059_v43 = vadd.f32 1.0, %v3365_v42 }
 0x71b   :  { %3366 = vrcp.f32 %v2050_v41 }
 0x71c   :  { %3368 = vrcp.f32 %v2059_v43 }
 0x725   :  { %v3367_v45 = vpop.eup %3366 }
 0x726   :  { %v2134_v47 = vmul.f32 %v3367_v45, %v2131_v44  ;;  %v3369_v50 = vpop.eup %3368 }
 0x727   :  { %v2137_v51 = vsub.f32 1.0, %v3369_v50  ;;  %v2139_v54 = vmul.f32 %v3369_v50, %v1898_v22 }
 0x728   :  { %v2135_v49 = vadd.f32 %v2134_v47, %v2063_v48 }
 0x72a   :  { %3370 = vtanh.f32 %v2135_v49 }
 0x734   :  { %v3371_v52 = vpop.eup %3370 }
 0x735   :  { %v2138_v53 = vmul.f32 %v3371_v52, %v2137_v51 }
 0x737   :  { %v3767_v57 = vadd.f32 %v2139_v54, %v2138_v53 }
 0x739   :  { %2142 = vst.msk [vmem:[#allocation5 + $0x30] sm:$0xff] %vm175_vm2, %v3767_v57  ;;  %3089 = vmatmul.mubr.msk.f32.vlgmr.msra.gmra.mrb[36].mxu1 %vm175_vm2, %v3767_v57  ;;  %3100 = vmatmul.mubr.msk.f32.vlgmr.msra.gmra.mrb[30].mxu0 %vm175_vm2, %v3767_v57 }
 0x73a   :  { %3285 = vmatpush3.bf16.msra.mxu1 %v3483_v19  ;;  %3292 = vmatpush3.bf16.msra.mxu0 %v3289_v23  ;;  %v2387_v19 = vld [vmem:[#allocation5 + $0x10] sm:$0xff] }
 0x73b   :  { %3121 = vmatprep.mubr.msk.f32.mxu0 %vm175_vm2, %v2385_v59  ;;  %3286 = vmatprep.subr.bf16.mxu1 %v3382_v18  ;;  %v2389_v18 = vld [vmem:[#allocation5 + $0x20] sm:$0xff] }
 0x73c   :  { %3294 = vmatprep.subr.bf16.mxu0 %v3293_v58  ;;  %3110 = vmatprep.mubr.msk.f32.mxu1 %vm3383_vm1, %v3384_v32 }
 0x73e   :  { %3288 = vmatpush3.bf16.msra.mxu1 %v3516_v28  ;;  %3296 = vmatpush3.bf16.msra.mxu0 %v3293_v58 }
 0x740   :  { %v2391_v28 = vld [vmem:[#allocation5 + $0x30] sm:$0xff] }
 0x741   :  { %3111 = vmatmul.mubr.msk.f32.vlgmr.msra.gmra.mrb[38].mxu1 %vm175_vm2, %v3767_v57  ;;  %3122 = vmatmul.mubr.msk.f32.vlgmr.msra.gmra.mrb[32].mxu0 %vm175_vm2, %v2386_v60 }
 0x742   :  { %3124 = vmatprep.mubr.msk.f32.mxu0 %vm175_vm2, %v2387_v19 }
 0x745   :  { %3125 = vmatmul.mubr.msk.f32.gmra.mrb[34].mxu0 %vm175_vm2, %v2388_v61 }
 0x746   :  { %3127 = vmatprep.mubr.msk.f32.mxu0 %vm175_vm2, %v2389_v18 }
 0x749   :  { %3128 = vmatmul.mubr.msk.f32.gmra.mrb[36].mxu0 %vm175_vm2, %v2390_v62 }
 0x74a   :  { %3130 = vmatprep.mubr.msk.f32.mxu0 %vm175_vm2, %v2391_v28 }
 0x80c   :  { %v2212_v32 = vpop.f32.mrb[36].mxu1  ;;  %v2282_v0 = vpop.f32.mrb[30].mxu0 }
 0x80d   :  { %v2288_v1 = vadd.f32 %v2287_v63, %v2212_v32  ;;  %v3090_v2 = vpop.f32.mrb[37].mxu1  ;;  %v3101_v3 = vpop.f32.mrb[31].mxu0  ;;  %v2297_v6 = vadd.f32 %v2296_v5, %v2282_v0 }
 0x80f   :  { %v2627_v4 = vmul.f32 -1.442695, %v2288_v1  ;;  %v2628_v8 = vmul.f32 -1.442695, %v2297_v6 }
 0x811   :  { %3372 = vpow2.f32 %v2627_v4 }
 0x812   :  { %3374 = vpow2.f32 %v2628_v8 }
 0x814   :  { %v2372_v9 = vpop.f32.mrb[38].mxu1  ;;  %v3123_v10 = vpop.f32.mrb[32].mxu0 }
 0x815   :  { %v2500_v11 = vadd.f32 %v3123_v10, %v2630_v7  ;;  %v3112_v12 = vpop.f32.mrb[39].mxu1  ;;  %v2494_v13 = vpop.f32.mrb[33].mxu0  ;;  %v2373_v27 = vadd.f32 %v3615_v46, %v2372_v9 }
 0x816   :  { %v2495_v14 = vadd.f32 %v2630_v7, %v2494_v13 }
 0x817   :  { %2535 = vst.msk [vmem:[%s3839_s7 + $0x8] sm:$0xff] %vm2533_vm3, %v2500_v11 }
 0x818   :  { %2534 = vst.msk [vmem:[%s3839_s7] sm:$0xff] %vm2533_vm3, %v2495_v14  ;;  %v3126_v15 = vpop.f32.mrb[34].mxu0 }
 0x819   :  { %v2510_v16 = vadd.f32 %v3126_v15, %v2630_v7  ;;  %v2504_v17 = vpop.f32.mrb[35].mxu0 }
 0x81a   :  { %v2505_v20 = vadd.f32 %v2630_v7, %v2504_v17 }
 0x81b   :  { %v3373_v21 = vpop.eup %3372  ;;  %2537 = vst.msk [vmem:[%s3839_s7 + $0x18] sm:$0xff] %vm2533_vm3, %v2510_v16 }
 0x81c   :  { %v2292_v22 = vadd.f32 1.0, %v3373_v21  ;;  %2536 = vst.msk [vmem:[%s3839_s7 + $0x10] sm:$0xff] %vm2533_vm3, %v2505_v20  ;;  %v3129_v25 = vpop.f32.mrb[36].mxu0  ;;  %v3375_v26 = vpop.eup %3374 }
 0x81d   :  { %v2520_v29 = vadd.f32 %v3129_v25, %v2630_v7  ;;  %v2514_v23 = vpop.f32.mrb[37].mxu0  ;;  %v2301_v33 = vadd.f32 1.0, %v3375_v26 }
 0x81e   :  { %3376 = vrcp.f32 %v2292_v22  ;;  %v2515_v24 = vadd.f32 %v2630_v7, %v2514_v23 }
 0x81f   :  { %2539 = vst.msk [vmem:[%s3839_s7 + $0x28] sm:$0xff] %vm2533_vm3, %v2520_v29  ;;  %3378 = vrcp.f32 %v2301_v33 }
 0x820   :  { %2538 = vst.msk [vmem:[%s3839_s7 + $0x20] sm:$0xff] %vm2533_vm3, %v2515_v24 }
 0x828   :  { %v3377_v30 = vpop.eup %3376 }
 0x829   :  { %v2376_v31 = vmul.f32 %v3377_v30, %v2373_v27  ;;  %v3379_v37 = vpop.eup %3378 }
 0x82a   :  { %v2379_v36 = vsub.f32 1.0, %v3379_v37  ;;  %v2381_v39 = vmul.f32 %v3379_v37, %v3767_v57 }
 0x82b   :  { %v2377_v35 = vadd.f32 %v2376_v31, %v2305_v34 }
 0x82d   :  { %3380 = vtanh.f32 %v2377_v35 }
 0x837   :  { %v3381_v38 = vpop.eup %3380 }
 0x838   :  { %v2380_v40 = vmul.f32 %v3381_v38, %v2379_v36 }
 0x83a   :  { %v2382_v41 = vadd.f32 %v2381_v39, %v2380_v40 }
 0x83c   :  { %2384 = vst.msk [vmem:[#allocation5 + $0x38] sm:$0xff] %vm175_vm2, %v2382_v41  ;;  %2542 = vst.msk [vmem:[%s3840_s8] sm:$0xff] %vm175_vm2, %v2382_v41 }
 0x843   :  { %v2392_v46 = vld [vmem:[#allocation5 + $0x38] sm:$0xff] }
 0x844   :  { %3131 = vmatmul.mubr.msk.f32.gmra.mrb[38].mxu0 %vm175_vm2, %v2392_v46 }
 0x917   :  { %v3132_v42 = vpop.f32.mrb[38].mxu0 }
 0x918   :  { %v2530_v43 = vadd.f32 %v3132_v42, %v2630_v7  ;;  %v2524_v44 = vpop.f32.mrb[39].mxu0 }
 0x919   :  { %v2525_v45 = vadd.f32 %v2630_v7, %v2524_v44 }
 0x91a   :  { %2541 = vst.msk [vmem:[%s3839_s7 + $0x38] sm:$0xff] %vm2533_vm3, %v2530_v43 }
 0x91b   :  { %2540 = vst.msk [vmem:[%s3839_s7 + $0x30] sm:$0xff] %vm2533_vm3, %v2525_v45 }

</bundles_post_ra>
